<compile_context>
chip_gen: v5e
topology: v5e:2x2
jax: 0.10.0
libtpu: 0.0.40
codegen_flags: <defaults>
</compile_context>

<pallas_src>
import functools

import numpy as np
import jax
import jax.numpy as jnp
from jax.experimental import pallas as pl
from jax.experimental.pallas import tpu as pltpu

# ----------------------------- model config --------------------------------
INPUT_DIM = 8            # input_dim
OUTPUT_DIM = 16          # output_dim
INT_DIM = 1 * 128        # int_dim * 128  (int_dim = 1)
INT_TRF = 32             # int_trf
N_CHANNELS = 4           # N_channels -> attention / transformer partitions
EMBED = INT_TRF // N_CHANNELS        # 8
N_PAIR = N_CHANNELS * N_CHANNELS     # 16 (i,j) partition pairs
REP = N_PAIR * EMBED                 # 128 replicated lanes
BATCH = 8

OUT_PAD = 128                        # lane-dense output width (>= OUTPUT_DIM)
BATCH_TILE = 1024                    # max rows per grid step for large batches
ROW_ALIGN = 16                       # sublane packing for bf16 activations
VMEM_LIMIT = 48 * 1024 * 1024        # above scoped default on all generations
MATMUL_DTYPE = jnp.bfloat16          # storage dtype of ALL matmul weights

PARAM_ORDER = ('w0', 'b0', 'wres', 'bres', 'res_sup', 'mid_sup', 'wp', 'bp',
               'supT', 'lnw', 'lnb', 'wqkv', 'bqkv', 'segsum', 'g16', 'pexp',
               'red', 'mbd', 'tb', 'tsup', 'wout', 'bout')

# Matmul-operand params (always bf16, single-pass MXU).
_MATMUL_KEYS = ('w0', 'wres', 'wp', 'wqkv', 'segsum', 'g16', 'pexp', 'red',
                'mbd', 'wout')
# Always-f32 params (layernorm is computed in f32; final bias adds into an
# f32 output slab).
_F32_KEYS = ('lnw', 'lnb', 'bout')


def _round_up(n, m):
    return ((n + m - 1) // m) * m


def _default_compute_dtype():
    """bf16 elementwise on bf16-native chips (v6e / v7x), f32 otherwise."""
    try:
        kind = jax.devices()[0].device_kind.lower()
    except Exception:
        return jnp.float32
    if any(g in kind for g in ("v2", "v3", "v4", "v5")):
        return jnp.float32
    return jnp.bfloat16


# --------------------------- fused forward kernel ----------------------------
def _trf_kernel(x_ref, w0_ref, b0_ref, wres_ref, bres_ref, res_sup_ref,
                mid_sup_ref, wp_ref, bp_ref, supT_ref, lnw_ref, lnb_ref,
                wqkv_ref, bqkv_ref, segsum_ref, g16_ref, pexp_ref, red_ref,
                mbd_ref, tb_ref, tsup_ref, wout_ref, bout_ref, o_ref, *, cdt):
    f32 = jnp.float32

    def mm(a, w):
        # activation cast to the weight storage dtype (bf16 -> no-op when the
        # compute dtype is already bf16); MXU accumulates in f32.
        return jnp.dot(a.astype(w.dtype), w, preferred_element_type=f32)

    def supact(x, sref, k):
        # Supact with constants pre-folded at pack time:
        #   rows [3k, 3k+1, 3k+2] = (c0, c1, bh);  y = x*(c0 + c1*tanh(bh*x))
        c0 = sref[3 * k + 0]
        c1 = sref[3 * k + 1]
        bh = sref[3 * k + 2]
        return x * (c0 + c1 * jnp.tanh(bh * x))

    # ---- Linear(input_dim, int_dim) + 3 x (ResBlock + Supact) + Linear + Supact
    # (scalar Affine norms are pre-folded into wres/bres at pack time)
    h = mm(x_ref[...], w0_ref[...]).astype(cdt) + b0_ref[...]
    for i in range(3):
        o1 = mm(h, wres_ref[2 * i + 0]).astype(cdt) + bres_ref[2 * i + 0]
        o1 = supact(o1, res_sup_ref, 2 * i + 0)
        o2 = mm(o1, wres_ref[2 * i + 1]).astype(cdt) + bres_ref[2 * i + 1]
        o2 = supact(o2, res_sup_ref, 2 * i + 1) + h
        h = supact(o2, mid_sup_ref, i)
    h = mm(h, wp_ref[...]).astype(cdt) + bp_ref[...]
    h = supact(h, supT_ref, 0)                         # (tb, INT_TRF), cdt

    # ---- Attention ----------------------------------------------------------
    # LayerNorm (eps=1e-5, biased variance, as torch) - statistics in f32.
    hf = h.astype(f32)
    mean = jnp.mean(hf, axis=1, keepdims=True)
    var = jnp.mean(jnp.square(hf - mean), axis=1, keepdims=True)
    xn = ((hf - mean) * jax.lax.rsqrt(var + 1e-5) * lnw_ref[...]
          + lnb_ref[...]).astype(cdt)

    # One matmul produces, for every (i,j) partition pair p = j*P+i, lanes
    # [p*E,(p+1)*E) of: q_rep = Q[b,i,:]/sqrt(E), k_rep = K[b,j,:], v_rep = V[b,j,:]
    qkv = mm(xn, wqkv_ref[...]).astype(cdt) + bqkv_ref[...]
    q_rep = qkv[:, 0 * REP:1 * REP]
    k_rep = qkv[:, 1 * REP:2 * REP]
    v_rep = qkv[:, 2 * REP:3 * REP]

    # scores[b, p] = <Q[b,i,:], K[b,j,:]> / sqrt(E)  (scale folded into wqkv)
    scores = mm(q_rep * k_rep, segsum_ref[...])        # (tb, N_PAIR), f32
    # softmax over i (dim=1 of (B,i,j)): groups share j = p // P.  Subtracting
    # the per-row global max is valid (constant within each group).
    m = jnp.max(scores, axis=1, keepdims=True)
    e = jnp.exp(scores - m)                            # f32, (tb, 16)
    denom = mm(e, g16_ref[...])                        # same-j group sums, f32
    sm = e * pl.reciprocal(denom, approx=True)         # f32, (tb, 16)
    # expand softmax weights back to 128 lanes, weight V, reduce over j
    sm_rep = mm(sm, pexp_ref[...]).astype(cdt)         # (tb, REP)
    prod = mm(sm_rep * v_rep, red_ref[...]).astype(cdt)   # (tb, INT_TRF)
    a = prod + h                                       # attention residual

    # ---- Transformer (Affine folded) + final Linear (+ final Affine folded) --
    o = mm(a, mbd_ref[...]).astype(cdt) + tb_ref[...]
    o = supact(o, tsup_ref, 0) + a
    # lane-dense (tb, 128) f32 output slab; cols >= OUTPUT_DIM are zero.
    o_ref[...] = mm(o, wout_ref[...]) + bout_ref[...]


# ------------------------------ parameters ----------------------------------
def init_params(key):
    kit = iter(jax.random.split(key, 128))

    def nrm(shape, scale):
        return (scale * jax.random.normal(next(kit), shape)).astype(jnp.float32)

    p = {}
    p['lin0_W'] = nrm((INT_DIM, INPUT_DIM), 0.05)     # torch Linear weight: (out, in)
    p['lin0_b'] = nrm((INT_DIM,), 0.05)
    p['res'] = []
    for _ in range(3):
        p['res'].append(dict(
            l1_W=nrm((INT_DIM, INT_DIM), 0.05), l1_b=nrm((INT_DIM,), 0.05),
            l2_W=nrm((INT_DIM, INT_DIM), 0.05), l2_b=nrm((INT_DIM,), 0.05),
            aff1_g=1.0 + nrm((), 0.1), aff1_b=nrm((), 0.1),
            aff2_g=1.0 + nrm((), 0.1), aff2_b=nrm((), 0.1),
            sup1_g=1.0 + nrm((INT_DIM,), 0.1), sup1_b=nrm((INT_DIM,), 0.1),
            sup2_g=1.0 + nrm((INT_DIM,), 0.1), sup2_b=nrm((INT_DIM,), 0.1)))
    p['mid_sup'] = [(1.0 + nrm((INT_DIM,), 0.1), nrm((INT_DIM,), 0.1))
                    for _ in range(3)]
    p['linp_W'] = nrm((INT_TRF, INT_DIM), 0.05)
    p['linp_b'] = nrm((INT_TRF,), 0.05)
    p['supT_g'] = 1.0 + nrm((INT_TRF,), 0.1)
    p['supT_b'] = nrm((INT_TRF,), 0.1)
    p['ln_w'] = 1.0 + nrm((INT_TRF,), 0.1)
    p['ln_b'] = nrm((INT_TRF,), 0.1)
    for n in ('Q', 'K', 'V'):
        p['W' + n] = nrm((EMBED, EMBED), 0.2)
        p['b' + n] = nrm((EMBED,), 0.05)
    p['t_gain'] = 1.0 + nrm((), 0.1)
    p['t_bias'] = nrm((), 0.1)
    p['tw'] = nrm((N_CHANNELS, EMBED, EMBED), 0.2)    # Transformer block weights
    p['t_b'] = nrm((INT_TRF,), 0.05)
    p['t_g'] = 1.0 + nrm((INT_TRF,), 0.1)
    p['t_be'] = nrm((INT_TRF,), 0.1)
    p['lout_W'] = nrm((OUTPUT_DIM, INT_TRF), 0.1)
    p['lout_b'] = nrm((OUTPUT_DIM,), 0.05)
    p['out_g'] = 1.0 + nrm((), 0.1)
    p['out_b'] = nrm((), 0.1)
    return p


def _fold_supact(gamma, beta):
    """Supact(gamma, beta) -> stacked (c0, c1, bh) rows, shape (3, 1, N)."""
    g = np.asarray(gamma, np.float32)
    b = np.asarray(beta, np.float32)
    return np.stack([0.5 * (1.0 + g), 0.5 * (1.0 - g), 0.5 * b])[:, None, :]


def pack_params(p, compute_dtype=jnp.float32):
    """Pack + pre-fold parameters for the fused kernel (plain numpy glue)."""
    P, E = N_CHANNELS, EMBED

    def A(v):
        return np.asarray(v, np.float32)

    pk = {}
    pk['w0'] = A(p['lin0_W']).T
    pk['b0'] = A(p['lin0_b'])[None, :]

    wres, bres, rsup, msup = [], [], [], []
    for i in range(3):
        r = p['res'][i]
        for wk, bk, gk, ck, sg, sb in (
                ('l1_W', 'l1_b', 'aff1_g', 'aff1_b', 'sup1_g', 'sup1_b'),
                ('l2_W', 'l2_b', 'aff2_g', 'aff2_b', 'sup2_g', 'sup2_b')):
            wt = A(r[wk]).T                                   # (in, out)
            g = float(A(r[gk]))
            c = float(A(r[ck]))
            # fold scalar Affine (x*g + c) into the following Linear
            wres.append(g * wt)
            bres.append((c * wt.sum(axis=0) + A(r[bk]))[None, :])
            rsup.append(_fold_supact(r[sg], r[sb]))
        msup.append(_fold_supact(p['mid_sup'][i][0], p['mid_sup'][i][1]))
    pk['wres'] = np.stack(wres)                       # (6, 128, 128)
    pk['bres'] = np.stack(bres)                       # (6, 1, 128)
    pk['res_sup'] = np.concatenate(rsup, axis=0)      # (18, 1, 128)
    pk['mid_sup'] = np.concatenate(msup, axis=0)      # (9, 1, 128)

    pk['wp'] = A(p['linp_W']).T
    pk['bp'] = A(p['linp_b'])[None, :]
    pk['supT'] = _fold_supact(p['supT_g'], p['supT_b'])      # (3, 1, 32)
    pk['lnw'] = A(p['ln_w'])[None, :]
    pk['lnb'] = A(p['ln_b'])[None, :]

    # --- pair-replicated Q/K/V weights, concatenated into one (32, 384) matmul
    # The 1/sqrt(E) attention scale is folded into the Q weight/bias (exact,
    # in f32) so segsum/g16/pexp/red below stay exact 0/1 in bf16.
    inv_scale = np.float32(1.0 / np.sqrt(E))
    WQ, bQ = A(p['WQ']).T * inv_scale, A(p['bQ']) * inv_scale
    WK, bK = A(p['WK']).T, A(p['bK'])
    WV, bV = A(p['WV']).T, A(p['bV'])
    wq = np.zeros((INT_TRF, REP), np.float32); bq = np.zeros((REP,), np.float32)
    wk = np.zeros((INT_TRF, REP), np.float32); bk = np.zeros((REP,), np.float32)
    wv = np.zeros((INT_TRF, REP), np.float32); bv = np.zeros((REP,), np.float32)
    for pp in range(N_PAIR):
        j, i = divmod(pp, P)                  # pair index pp = j*P + i
        sl = slice(pp * E, (pp + 1) * E)
        wq[i * E:(i + 1) * E, sl] = WQ; bq[sl] = bQ       # Q of partition i
        wk[j * E:(j + 1) * E, sl] = WK; bk[sl] = bK       # K of partition j
        wv[j * E:(j + 1) * E, sl] = WV; bv[sl] = bV       # V of partition j
    pk['wqkv'] = np.concatenate([wq, wk, wv], axis=1)     # (32, 384)
    pk['bqkv'] = np.concatenate([bq, bk, bv])[None, :]    # (1, 384)

    # --- constant segment-sum / replication / reduction matrices (exact 0/1)
    segsum = np.zeros((REP, N_PAIR), np.float32)          # lane-segment sum
    pexp = np.zeros((N_PAIR, REP), np.float32)            # pair -> 8 lanes expand
    red = np.zeros((REP, INT_TRF), np.float32)            # reduce over j
    for pp in range(N_PAIR):
        j, i = divmod(pp, P)
        segsum[pp * E:(pp + 1) * E, pp] = 1.0
        pexp[pp, pp * E:(pp + 1) * E] = 1.0
        for e in range(E):
            red[pp * E + e, i * E + e] = 1.0
    g16 = np.zeros((N_PAIR, N_PAIR), np.float32)          # same-j group sum
    for a_ in range(N_PAIR):
        for b_ in range(N_PAIR):
            if a_ // P == b_ // P:
                g16[a_, b_] = 1.0
    pk['segsum'] = segsum
    pk['g16'] = g16
    pk['pexp'] = pexp
    pk['red'] = red

    # --- Transformer block-diag matmul with its scalar Affine folded in
    mat = np.zeros((INT_TRF, INT_TRF), np.float32)
    tw = A(p['tw'])
    for q in range(P):
        mat[q * E:(q + 1) * E, q * E:(q + 1) * E] = tw[q]
    tg = float(A(p['t_gain'])); tbias = float(A(p['t_bias']))
    pk['mbd'] = tg * mat
    pk['tb'] = (tbias * mat.sum(axis=0) + A(p['t_b']))[None, :]
    pk['tsup'] = _fold_supact(p['t_g'], p['t_be'])         # (3, 1, 32)

    # --- final Linear with the final scalar Affine folded in, zero-padded to a
    #     lane-dense 128-wide output slab.
    og = float(A(p['out_g'])); ob = float(A(p['out_b']))
    wout = np.zeros((INT_TRF, OUT_PAD), np.float32)
    bout = np.zeros((OUT_PAD,), np.float32)
    wout[:, :OUTPUT_DIM] = og * A(p['lout_W']).T
    bout[:OUTPUT_DIM] = og * A(p['lout_b']) + ob
    pk['wout'] = wout
    pk['bout'] = bout[None, :]

    out = {}
    for k, v in pk.items():
        if k in _MATMUL_KEYS:
            dt = MATMUL_DTYPE
        elif k in _F32_KEYS:
            dt = jnp.float32
        else:
            dt = compute_dtype
        out[k] = jnp.asarray(v, dtype=dt)
    return out


# ------------------------------ forward (Pallas) -----------------------------
def _full_spec(a):
    nd = a.ndim
    return pl.BlockSpec(a.shape, lambda *args, _nd=nd: (0,) * _nd)


def _pick_tile(B):
    if B <= 2 * ROW_ALIGN:
        return _round_up(B, ROW_ALIGN)                 # tiny batch: one step
    # >= 2 grid steps whenever possible so both v7x TensorCores get work.
    half = _round_up(-(-B // 2), ROW_ALIGN)
    return min(BATCH_TILE, half)


def _trf_forward(x, pk):
    B = x.shape[0]
    cdt = pk['b0'].dtype                               # compute dtype (bf16/f32)
    tb = _pick_tile(B)
    Bp = _round_up(B, tb)
    xp = jnp.pad(x, ((0, Bp - B), (0, 0))) if Bp != B else x

    params = [pk[k] for k in PARAM_ORDER]
    in_specs = [pl.BlockSpec((tb, INPUT_DIM), lambda i: (i, 0))]
    in_specs += [_full_spec(a) for a in params]

    y = pl.pallas_call(
        functools.partial(_trf_kernel, cdt=cdt),
        out_shape=jax.ShapeDtypeStruct((Bp, OUT_PAD), jnp.float32),
        grid=(Bp // tb,),
        in_specs=in_specs,
        out_specs=pl.BlockSpec((tb, OUT_PAD), lambda i: (i, 0)),
        compiler_params=pltpu.CompilerParams(
            dimension_semantics=("parallel",),
            vmem_limit_bytes=VMEM_LIMIT),
    )(xp, *params)
    return y[:B, :OUTPUT_DIM]


trf_forward = jax.jit(_trf_forward)


# ------------------------------ pure-JAX reference ---------------------------
def trf_reference(x, p):
    def supact(z, g, b):
        inv = 1.0 / (1.0 + jnp.exp(-(b * z)))
        return (g + inv * (1.0 - g)) * z

    h = x @ p['lin0_W'].T + p['lin0_b']
    for i in range(3):
        r = p['res'][i]
        o1 = supact((h * r['aff1_g'] + r['aff1_b']) @ r['l1_W'].T + r['l1_b'],
                    r['sup1_g'], r['sup1_b'])
        o2 = supact((o1 * r['aff2_g'] + r['aff2_b']) @ r['l2_W'].T + r['l2_b'],
                    r['sup2_g'], r['sup2_b']) + h
        h = supact(o2, p['mid_sup'][i][0], p['mid_sup'][i][1])
    h = supact(h @ p['linp_W'].T + p['linp_b'], p['supT_g'], p['supT_b'])
    # Attention
    mean = h.mean(axis=1, keepdims=True)
    var = ((h - mean) ** 2).mean(axis=1, keepdims=True)
    xn = (h - mean) / jnp.sqrt(var + 1e-5) * p['ln_w'] + p['ln_b']
    _x = xn.reshape(h.shape[0], N_CHANNELS, EMBED)
    Q = _x @ p['WQ'].T + p['bQ']
    K = _x @ p['WK'].T + p['bK']
    V = _x @ p['WV'].T + p['bV']
    dp = jnp.einsum('bie,bje->bij', Q, K) / np.sqrt(EMBED)
    sm = jax.nn.softmax(dp, axis=1)                 # softmax over dim=1, as in torch
    prod = jnp.einsum('bij,bje->bie', sm, V)
    h = prod.reshape(h.shape[0], -1) + h
    # Transformer
    mat = jax.scipy.linalg.block_diag(*[p['tw'][q] for q in range(N_CHANNELS)])
    o = supact((h * p['t_gain'] + p['t_bias']) @ mat + p['t_b'],
               p['t_g'], p['t_be'])
    h = o + h
    y = h @ p['lout_W'].T + p['lout_b']
    return y * p['out_g'] + p['out_b']


# ------------------------------------ main -----------------------------------
if __name__ == "__main__":
    key = jax.random.PRNGKey(0)
    pkey, xkey = jax.random.split(key)
    params = init_params(pkey)
    cdt = _default_compute_dtype()
    packed = pack_params(params, compute_dtype=cdt)
    x = jax.random.normal(xkey, (BATCH, INPUT_DIM), dtype=jnp.float32)

    out = jax.block_until_ready(trf_forward(x, packed))
    assert out.shape == (BATCH, OUTPUT_DIM)

    ref = np.asarray(trf_reference(x, params))
    diff = float(np.max(np.abs(np.asarray(out) - ref)))
    # f32-elementwise mode (v5e and older): 2e-2 tolerance as before (bf16
    # matmul weights + approx reciprocal).  bf16-elementwise mode (v6e/v7x):
    # slightly wider 3e-2 tolerance to cover bf16 activation round-off.
    tol = 2e-2 if cdt == jnp.float32 else 3e-2
    if not np.allclose(np.asarray(out), ref, rtol=tol, atol=tol):
        raise SystemExit("mismatch vs JAX reference: max abs diff = %g" % diff)

    print("KERNEL_OK")
</pallas_src>

<mosaic_0001>
module attributes {stable_mosaic.version = 11 : i64} {
  func.func @_trf_kernel(%arg0: i32, %arg1: memref<16x8xf32, #tpu.memory_space<vmem>>, %arg2: memref<8x128xbf16, #tpu.memory_space<vmem>>, %arg3: memref<1x128xbf16, #tpu.memory_space<vmem>>, %arg4: memref<6x128x128xbf16, #tpu.memory_space<vmem>>, %arg5: memref<6x1x128xbf16, #tpu.memory_space<vmem>>, %arg6: memref<18x1x128xbf16, #tpu.memory_space<vmem>>, %arg7: memref<9x1x128xbf16, #tpu.memory_space<vmem>>, %arg8: memref<128x32xbf16, #tpu.memory_space<vmem>>, %arg9: memref<1x32xbf16, #tpu.memory_space<vmem>>, %arg10: memref<3x1x32xbf16, #tpu.memory_space<vmem>>, %arg11: memref<1x32xf32, #tpu.memory_space<vmem>>, %arg12: memref<1x32xf32, #tpu.memory_space<vmem>>, %arg13: memref<32x384xbf16, #tpu.memory_space<vmem>>, %arg14: memref<1x384xbf16, #tpu.memory_space<vmem>>, %arg15: memref<128x16xbf16, #tpu.memory_space<vmem>>, %arg16: memref<16x16xbf16, #tpu.memory_space<vmem>>, %arg17: memref<16x128xbf16, #tpu.memory_space<vmem>>, %arg18: memref<128x32xbf16, #tpu.memory_space<vmem>>, %arg19: memref<32x32xbf16, #tpu.memory_space<vmem>>, %arg20: memref<1x32xbf16, #tpu.memory_space<vmem>>, %arg21: memref<3x1x32xbf16, #tpu.memory_space<vmem>>, %arg22: memref<32x128xbf16, #tpu.memory_space<vmem>>, %arg23: memref<1x128xf32, #tpu.memory_space<vmem>>, %arg24: memref<16x128xf32, #tpu.memory_space<vmem>>) attributes {dimension_semantics = [#tpu.dimension_semantics<parallel>], iteration_bounds = array<i64: 1>, scalar_prefetch = 0 : i64, scratch_operands = 0 : i64, tpu.core_type = #tpu.core_type<tc>, window_params = [{transform_indices = @transform_0, window_bounds = array<i64: 16, 8>}, {pipeline_mode = #tpu.pipeline_mode<synchronous>, transform_indices = @transform_1, window_bounds = array<i64: 8, 128>}, {pipeline_mode = #tpu.pipeline_mode<synchronous>, transform_indices = @transform_2, window_bounds = array<i64: 1, 128>}, {pipeline_mode = #tpu.pipeline_mode<synchronous>, transform_indices = @transform_3, window_bounds = array<i64: 6, 128, 128>}, {pipeline_mode = #tpu.pipeline_mode<synchronous>, transform_indices = @transform_4, window_bounds = array<i64: 6, 1, 128>}, {pipeline_mode = #tpu.pipeline_mode<synchronous>, transform_indices = @transform_5, window_bounds = array<i64: 18, 1, 128>}, {pipeline_mode = #tpu.pipeline_mode<synchronous>, transform_indices = @transform_6, window_bounds = array<i64: 9, 1, 128>}, {pipeline_mode = #tpu.pipeline_mode<synchronous>, transform_indices = @transform_7, window_bounds = array<i64: 128, 32>}, {pipeline_mode = #tpu.pipeline_mode<synchronous>, transform_indices = @transform_8, window_bounds = array<i64: 1, 32>}, {pipeline_mode = #tpu.pipeline_mode<synchronous>, transform_indices = @transform_9, window_bounds = array<i64: 3, 1, 32>}, {pipeline_mode = #tpu.pipeline_mode<synchronous>, transform_indices = @transform_10, window_bounds = array<i64: 1, 32>}, {pipeline_mode = #tpu.pipeline_mode<synchronous>, transform_indices = @transform_11, window_bounds = array<i64: 1, 32>}, {pipeline_mode = #tpu.pipeline_mode<synchronous>, transform_indices = @transform_12, window_bounds = array<i64: 32, 384>}, {pipeline_mode = #tpu.pipeline_mode<synchronous>, transform_indices = @transform_13, window_bounds = array<i64: 1, 384>}, {pipeline_mode = #tpu.pipeline_mode<synchronous>, transform_indices = @transform_14, window_bounds = array<i64: 128, 16>}, {pipeline_mode = #tpu.pipeline_mode<synchronous>, transform_indices = @transform_15, window_bounds = array<i64: 16, 16>}, {pipeline_mode = #tpu.pipeline_mode<synchronous>, transform_indices = @transform_16, window_bounds = array<i64: 16, 128>}, {pipeline_mode = #tpu.pipeline_mode<synchronous>, transform_indices = @transform_17, window_bounds = array<i64: 128, 32>}, {pipeline_mode = #tpu.pipeline_mode<synchronous>, transform_indices = @transform_18, window_bounds = array<i64: 32, 32>}, {pipeline_mode = #tpu.pipeline_mode<synchronous>, transform_indices = @transform_19, window_bounds = array<i64: 1, 32>}, {pipeline_mode = #tpu.pipeline_mode<synchronous>, transform_indices = @transform_20, window_bounds = array<i64: 3, 1, 32>}, {pipeline_mode = #tpu.pipeline_mode<synchronous>, transform_indices = @transform_21, window_bounds = array<i64: 32, 128>}, {pipeline_mode = #tpu.pipeline_mode<synchronous>, transform_indices = @transform_22, window_bounds = array<i64: 1, 128>}, {transform_indices = @transform_23, window_bounds = array<i64: 16, 128>}]} {
    %c0 = arith.constant 0 : index
    %c0_0 = arith.constant 0 : index
    %0 = vector.load %arg1[%c0, %c0_0] : memref<16x8xf32, #tpu.memory_space<vmem>>, vector<16x8xf32>
    %c0_1 = arith.constant 0 : index
    %c0_2 = arith.constant 0 : index
    %1 = vector.load %arg2[%c0_1, %c0_2] : memref<8x128xbf16, #tpu.memory_space<vmem>>, vector<8x128xbf16>
    %2 = arith.truncf %0 : vector<16x8xf32> to vector<16x8xbf16>
    %cst = arith.constant dense<0.000000e+00> : vector<16x128xf32>
    %3 = tpu.matmul %2, %1, %cst {dimension_numbers = #tpu.dot_dimension_numbers<[1], [0], [0], [1], [0, 0, 1, 1], [], []>} : vector<16x8xbf16>, vector<8x128xbf16>, vector<16x128xf32> -> vector<16x128xf32>
    %4 = arith.truncf %3 : vector<16x128xf32> to vector<16x128xbf16>
    %c0_3 = arith.constant 0 : index
    %c0_4 = arith.constant 0 : index
    %5 = vector.load %arg3[%c0_3, %c0_4] : memref<1x128xbf16, #tpu.memory_space<vmem>>, vector<1x128xbf16>
    %6 = vector.broadcast %5 : vector<1x128xbf16> to vector<16x128xbf16>
    %7 = arith.addf %4, %6 : vector<16x128xbf16>
    %c0_5 = arith.constant 0 : index
    %c0_6 = arith.constant 0 : index
    %c0_7 = arith.constant 0 : index
    %8 = vector.load %arg4[%c0_5, %c0_6, %c0_7] : memref<6x128x128xbf16, #tpu.memory_space<vmem>>, vector<1x128x128xbf16>
    %9 = vector.shape_cast %8 : vector<1x128x128xbf16> to vector<128x128xbf16>
    %cst_8 = arith.constant dense<0.000000e+00> : vector<16x128xf32>
    %10 = tpu.matmul %7, %9, %cst_8 {dimension_numbers = #tpu.dot_dimension_numbers<[1], [0], [0], [1], [0, 0, 1, 1], [], []>} : vector<16x128xbf16>, vector<128x128xbf16>, vector<16x128xf32> -> vector<16x128xf32>
    %11 = arith.truncf %10 : vector<16x128xf32> to vector<16x128xbf16>
    %c0_9 = arith.constant 0 : index
    %c0_10 = arith.constant 0 : index
    %c0_11 = arith.constant 0 : index
    %12 = vector.load %arg5[%c0_9, %c0_10, %c0_11] : memref<6x1x128xbf16, #tpu.memory_space<vmem>>, vector<1x1x128xbf16>
    %13 = vector.shape_cast %12 : vector<1x1x128xbf16> to vector<1x128xbf16>
    %14 = vector.broadcast %13 : vector<1x128xbf16> to vector<16x128xbf16>
    %15 = arith.addf %11, %14 : vector<16x128xbf16>
    %c0_12 = arith.constant 0 : index
    %c0_13 = arith.constant 0 : index
    %c0_14 = arith.constant 0 : index
    %16 = vector.load %arg6[%c0_12, %c0_13, %c0_14] : memref<18x1x128xbf16, #tpu.memory_space<vmem>>, vector<1x1x128xbf16>
    %17 = vector.shape_cast %16 : vector<1x1x128xbf16> to vector<1x128xbf16>
    %c1 = arith.constant 1 : index
    %c0_15 = arith.constant 0 : index
    %c0_16 = arith.constant 0 : index
    %18 = vector.load %arg6[%c1, %c0_15, %c0_16] : memref<18x1x128xbf16, #tpu.memory_space<vmem>>, vector<1x1x128xbf16>
    %19 = vector.shape_cast %18 : vector<1x1x128xbf16> to vector<1x128xbf16>
    %c2 = arith.constant 2 : index
    %c0_17 = arith.constant 0 : index
    %c0_18 = arith.constant 0 : index
    %20 = vector.load %arg6[%c2, %c0_17, %c0_18] : memref<18x1x128xbf16, #tpu.memory_space<vmem>>, vector<1x1x128xbf16>
    %21 = vector.shape_cast %20 : vector<1x1x128xbf16> to vector<1x128xbf16>
    %22 = vector.broadcast %21 : vector<1x128xbf16> to vector<16x128xbf16>
    %23 = arith.mulf %22, %15 : vector<16x128xbf16>
    %24 = math.tanh %23 : vector<16x128xbf16>
    %25 = vector.broadcast %19 : vector<1x128xbf16> to vector<16x128xbf16>
    %26 = arith.mulf %25, %24 : vector<16x128xbf16>
    %27 = vector.broadcast %17 : vector<1x128xbf16> to vector<16x128xbf16>
    %28 = arith.addf %27, %26 : vector<16x128xbf16>
    %29 = arith.mulf %15, %28 : vector<16x128xbf16>
    %c1_19 = arith.constant 1 : index
    %c0_20 = arith.constant 0 : index
    %c0_21 = arith.constant 0 : index
    %30 = vector.load %arg4[%c1_19, %c0_20, %c0_21] : memref<6x128x128xbf16, #tpu.memory_space<vmem>>, vector<1x128x128xbf16>
    %31 = vector.shape_cast %30 : vector<1x128x128xbf16> to vector<128x128xbf16>
    %cst_22 = arith.constant dense<0.000000e+00> : vector<16x128xf32>
    %32 = tpu.matmul %29, %31, %cst_22 {dimension_numbers = #tpu.dot_dimension_numbers<[1], [0], [0], [1], [0, 0, 1, 1], [], []>} : vector<16x128xbf16>, vector<128x128xbf16>, vector<16x128xf32> -> vector<16x128xf32>
    %33 = arith.truncf %32 : vector<16x128xf32> to vector<16x128xbf16>
    %c1_23 = arith.constant 1 : index
    %c0_24 = arith.constant 0 : index
    %c0_25 = arith.constant 0 : index
    %34 = vector.load %arg5[%c1_23, %c0_24, %c0_25] : memref<6x1x128xbf16, #tpu.memory_space<vmem>>, vector<1x1x128xbf16>
    %35 = vector.shape_cast %34 : vector<1x1x128xbf16> to vector<1x128xbf16>
    %36 = vector.broadcast %35 : vector<1x128xbf16> to vector<16x128xbf16>
    %37 = arith.addf %33, %36 : vector<16x128xbf16>
    %c3 = arith.constant 3 : index
    %c0_26 = arith.constant 0 : index
    %c0_27 = arith.constant 0 : index
    %38 = vector.load %arg6[%c3, %c0_26, %c0_27] : memref<18x1x128xbf16, #tpu.memory_space<vmem>>, vector<1x1x128xbf16>
    %39 = vector.shape_cast %38 : vector<1x1x128xbf16> to vector<1x128xbf16>
    %c4 = arith.constant 4 : index
    %c0_28 = arith.constant 0 : index
    %c0_29 = arith.constant 0 : index
    %40 = vector.load %arg6[%c4, %c0_28, %c0_29] : memref<18x1x128xbf16, #tpu.memory_space<vmem>>, vector<1x1x128xbf16>
    %41 = vector.shape_cast %40 : vector<1x1x128xbf16> to vector<1x128xbf16>
    %c5 = arith.constant 5 : index
    %c0_30 = arith.constant 0 : index
    %c0_31 = arith.constant 0 : index
    %42 = vector.load %arg6[%c5, %c0_30, %c0_31] : memref<18x1x128xbf16, #tpu.memory_space<vmem>>, vector<1x1x128xbf16>
    %43 = vector.shape_cast %42 : vector<1x1x128xbf16> to vector<1x128xbf16>
    %44 = vector.broadcast %43 : vector<1x128xbf16> to vector<16x128xbf16>
    %45 = arith.mulf %44, %37 : vector<16x128xbf16>
    %46 = math.tanh %45 : vector<16x128xbf16>
    %47 = vector.broadcast %41 : vector<1x128xbf16> to vector<16x128xbf16>
    %48 = arith.mulf %47, %46 : vector<16x128xbf16>
    %49 = vector.broadcast %39 : vector<1x128xbf16> to vector<16x128xbf16>
    %50 = arith.addf %49, %48 : vector<16x128xbf16>
    %51 = arith.mulf %37, %50 : vector<16x128xbf16>
    %52 = arith.addf %51, %7 : vector<16x128xbf16>
    %c0_32 = arith.constant 0 : index
    %c0_33 = arith.constant 0 : index
    %c0_34 = arith.constant 0 : index
    %53 = vector.load %arg7[%c0_32, %c0_33, %c0_34] : memref<9x1x128xbf16, #tpu.memory_space<vmem>>, vector<1x1x128xbf16>
    %54 = vector.shape_cast %53 : vector<1x1x128xbf16> to vector<1x128xbf16>
    %c1_35 = arith.constant 1 : index
    %c0_36 = arith.constant 0 : index
    %c0_37 = arith.constant 0 : index
    %55 = vector.load %arg7[%c1_35, %c0_36, %c0_37] : memref<9x1x128xbf16, #tpu.memory_space<vmem>>, vector<1x1x128xbf16>
    %56 = vector.shape_cast %55 : vector<1x1x128xbf16> to vector<1x128xbf16>
    %c2_38 = arith.constant 2 : index
    %c0_39 = arith.constant 0 : index
    %c0_40 = arith.constant 0 : index
    %57 = vector.load %arg7[%c2_38, %c0_39, %c0_40] : memref<9x1x128xbf16, #tpu.memory_space<vmem>>, vector<1x1x128xbf16>
    %58 = vector.shape_cast %57 : vector<1x1x128xbf16> to vector<1x128xbf16>
    %59 = vector.broadcast %58 : vector<1x128xbf16> to vector<16x128xbf16>
    %60 = arith.mulf %59, %52 : vector<16x128xbf16>
    %61 = math.tanh %60 : vector<16x128xbf16>
    %62 = vector.broadcast %56 : vector<1x128xbf16> to vector<16x128xbf16>
    %63 = arith.mulf %62, %61 : vector<16x128xbf16>
    %64 = vector.broadcast %54 : vector<1x128xbf16> to vector<16x128xbf16>
    %65 = arith.addf %64, %63 : vector<16x128xbf16>
    %66 = arith.mulf %52, %65 : vector<16x128xbf16>
    %c2_41 = arith.constant 2 : index
    %c0_42 = arith.constant 0 : index
    %c0_43 = arith.constant 0 : index
    %67 = vector.load %arg4[%c2_41, %c0_42, %c0_43] : memref<6x128x128xbf16, #tpu.memory_space<vmem>>, vector<1x128x128xbf16>
    %68 = vector.shape_cast %67 : vector<1x128x128xbf16> to vector<128x128xbf16>
    %cst_44 = arith.constant dense<0.000000e+00> : vector<16x128xf32>
    %69 = tpu.matmul %66, %68, %cst_44 {dimension_numbers = #tpu.dot_dimension_numbers<[1], [0], [0], [1], [0, 0, 1, 1], [], []>} : vector<16x128xbf16>, vector<128x128xbf16>, vector<16x128xf32> -> vector<16x128xf32>
    %70 = arith.truncf %69 : vector<16x128xf32> to vector<16x128xbf16>
    %c2_45 = arith.constant 2 : index
    %c0_46 = arith.constant 0 : index
    %c0_47 = arith.constant 0 : index
    %71 = vector.load %arg5[%c2_45, %c0_46, %c0_47] : memref<6x1x128xbf16, #tpu.memory_space<vmem>>, vector<1x1x128xbf16>
    %72 = vector.shape_cast %71 : vector<1x1x128xbf16> to vector<1x128xbf16>
    %73 = vector.broadcast %72 : vector<1x128xbf16> to vector<16x128xbf16>
    %74 = arith.addf %70, %73 : vector<16x128xbf16>
    %c6 = arith.constant 6 : index
    %c0_48 = arith.constant 0 : index
    %c0_49 = arith.constant 0 : index
    %75 = vector.load %arg6[%c6, %c0_48, %c0_49] : memref<18x1x128xbf16, #tpu.memory_space<vmem>>, vector<1x1x128xbf16>
    %76 = vector.shape_cast %75 : vector<1x1x128xbf16> to vector<1x128xbf16>
    %c7 = arith.constant 7 : index
    %c0_50 = arith.constant 0 : index
    %c0_51 = arith.constant 0 : index
    %77 = vector.load %arg6[%c7, %c0_50, %c0_51] : memref<18x1x128xbf16, #tpu.memory_space<vmem>>, vector<1x1x128xbf16>
    %78 = vector.shape_cast %77 : vector<1x1x128xbf16> to vector<1x128xbf16>
    %c8 = arith.constant 8 : index
    %c0_52 = arith.constant 0 : index
    %c0_53 = arith.constant 0 : index
    %79 = vector.load %arg6[%c8, %c0_52, %c0_53] : memref<18x1x128xbf16, #tpu.memory_space<vmem>>, vector<1x1x128xbf16>
    %80 = vector.shape_cast %79 : vector<1x1x128xbf16> to vector<1x128xbf16>
    %81 = vector.broadcast %80 : vector<1x128xbf16> to vector<16x128xbf16>
    %82 = arith.mulf %81, %74 : vector<16x128xbf16>
    %83 = math.tanh %82 : vector<16x128xbf16>
    %84 = vector.broadcast %78 : vector<1x128xbf16> to vector<16x128xbf16>
    %85 = arith.mulf %84, %83 : vector<16x128xbf16>
    %86 = vector.broadcast %76 : vector<1x128xbf16> to vector<16x128xbf16>
    %87 = arith.addf %86, %85 : vector<16x128xbf16>
    %88 = arith.mulf %74, %87 : vector<16x128xbf16>
    %c3_54 = arith.constant 3 : index
    %c0_55 = arith.constant 0 : index
    %c0_56 = arith.constant 0 : index
    %89 = vector.load %arg4[%c3_54, %c0_55, %c0_56] : memref<6x128x128xbf16, #tpu.memory_space<vmem>>, vector<1x128x128xbf16>
    %90 = vector.shape_cast %89 : vector<1x128x128xbf16> to vector<128x128xbf16>
    %cst_57 = arith.constant dense<0.000000e+00> : vector<16x128xf32>
    %91 = tpu.matmul %88, %90, %cst_57 {dimension_numbers = #tpu.dot_dimension_numbers<[1], [0], [0], [1], [0, 0, 1, 1], [], []>} : vector<16x128xbf16>, vector<128x128xbf16>, vector<16x128xf32> -> vector<16x128xf32>
    %92 = arith.truncf %91 : vector<16x128xf32> to vector<16x128xbf16>
    %c3_58 = arith.constant 3 : index
    %c0_59 = arith.constant 0 : index
    %c0_60 = arith.constant 0 : index
    %93 = vector.load %arg5[%c3_58, %c0_59, %c0_60] : memref<6x1x128xbf16, #tpu.memory_space<vmem>>, vector<1x1x128xbf16>
    %94 = vector.shape_cast %93 : vector<1x1x128xbf16> to vector<1x128xbf16>
    %95 = vector.broadcast %94 : vector<1x128xbf16> to vector<16x128xbf16>
    %96 = arith.addf %92, %95 : vector<16x128xbf16>
    %c9 = arith.constant 9 : index
    %c0_61 = arith.constant 0 : index
    %c0_62 = arith.constant 0 : index
    %97 = vector.load %arg6[%c9, %c0_61, %c0_62] : memref<18x1x128xbf16, #tpu.memory_space<vmem>>, vector<1x1x128xbf16>
    %98 = vector.shape_cast %97 : vector<1x1x128xbf16> to vector<1x128xbf16>
    %c10 = arith.constant 10 : index
    %c0_63 = arith.constant 0 : index
    %c0_64 = arith.constant 0 : index
    %99 = vector.load %arg6[%c10, %c0_63, %c0_64] : memref<18x1x128xbf16, #tpu.memory_space<vmem>>, vector<1x1x128xbf16>
    %100 = vector.shape_cast %99 : vector<1x1x128xbf16> to vector<1x128xbf16>
    %c11 = arith.constant 11 : index
    %c0_65 = arith.constant 0 : index
    %c0_66 = arith.constant 0 : index
    %101 = vector.load %arg6[%c11, %c0_65, %c0_66] : memref<18x1x128xbf16, #tpu.memory_space<vmem>>, vector<1x1x128xbf16>
    %102 = vector.shape_cast %101 : vector<1x1x128xbf16> to vector<1x128xbf16>
    %103 = vector.broadcast %102 : vector<1x128xbf16> to vector<16x128xbf16>
    %104 = arith.mulf %103, %96 : vector<16x128xbf16>
    %105 = math.tanh %104 : vector<16x128xbf16>
    %106 = vector.broadcast %100 : vector<1x128xbf16> to vector<16x128xbf16>
    %107 = arith.mulf %106, %105 : vector<16x128xbf16>
    %108 = vector.broadcast %98 : vector<1x128xbf16> to vector<16x128xbf16>
    %109 = arith.addf %108, %107 : vector<16x128xbf16>
    %110 = arith.mulf %96, %109 : vector<16x128xbf16>
    %111 = arith.addf %110, %66 : vector<16x128xbf16>
    %c3_67 = arith.constant 3 : index
    %c0_68 = arith.constant 0 : index
    %c0_69 = arith.constant 0 : index
    %112 = vector.load %arg7[%c3_67, %c0_68, %c0_69] : memref<9x1x128xbf16, #tpu.memory_space<vmem>>, vector<1x1x128xbf16>
    %113 = vector.shape_cast %112 : vector<1x1x128xbf16> to vector<1x128xbf16>
    %c4_70 = arith.constant 4 : index
    %c0_71 = arith.constant 0 : index
    %c0_72 = arith.constant 0 : index
    %114 = vector.load %arg7[%c4_70, %c0_71, %c0_72] : memref<9x1x128xbf16, #tpu.memory_space<vmem>>, vector<1x1x128xbf16>
    %115 = vector.shape_cast %114 : vector<1x1x128xbf16> to vector<1x128xbf16>
    %c5_73 = arith.constant 5 : index
    %c0_74 = arith.constant 0 : index
    %c0_75 = arith.constant 0 : index
    %116 = vector.load %arg7[%c5_73, %c0_74, %c0_75] : memref<9x1x128xbf16, #tpu.memory_space<vmem>>, vector<1x1x128xbf16>
    %117 = vector.shape_cast %116 : vector<1x1x128xbf16> to vector<1x128xbf16>
    %118 = vector.broadcast %117 : vector<1x128xbf16> to vector<16x128xbf16>
    %119 = arith.mulf %118, %111 : vector<16x128xbf16>
    %120 = math.tanh %119 : vector<16x128xbf16>
    %121 = vector.broadcast %115 : vector<1x128xbf16> to vector<16x128xbf16>
    %122 = arith.mulf %121, %120 : vector<16x128xbf16>
    %123 = vector.broadcast %113 : vector<1x128xbf16> to vector<16x128xbf16>
    %124 = arith.addf %123, %122 : vector<16x128xbf16>
    %125 = arith.mulf %111, %124 : vector<16x128xbf16>
    %c4_76 = arith.constant 4 : index
    %c0_77 = arith.constant 0 : index
    %c0_78 = arith.constant 0 : index
    %126 = vector.load %arg4[%c4_76, %c0_77, %c0_78] : memref<6x128x128xbf16, #tpu.memory_space<vmem>>, vector<1x128x128xbf16>
    %127 = vector.shape_cast %126 : vector<1x128x128xbf16> to vector<128x128xbf16>
    %cst_79 = arith.constant dense<0.000000e+00> : vector<16x128xf32>
    %128 = tpu.matmul %125, %127, %cst_79 {dimension_numbers = #tpu.dot_dimension_numbers<[1], [0], [0], [1], [0, 0, 1, 1], [], []>} : vector<16x128xbf16>, vector<128x128xbf16>, vector<16x128xf32> -> vector<16x128xf32>
    %129 = arith.truncf %128 : vector<16x128xf32> to vector<16x128xbf16>
    %c4_80 = arith.constant 4 : index
    %c0_81 = arith.constant 0 : index
    %c0_82 = arith.constant 0 : index
    %130 = vector.load %arg5[%c4_80, %c0_81, %c0_82] : memref<6x1x128xbf16, #tpu.memory_space<vmem>>, vector<1x1x128xbf16>
    %131 = vector.shape_cast %130 : vector<1x1x128xbf16> to vector<1x128xbf16>
    %132 = vector.broadcast %131 : vector<1x128xbf16> to vector<16x128xbf16>
    %133 = arith.addf %129, %132 : vector<16x128xbf16>
    %c12 = arith.constant 12 : index
    %c0_83 = arith.constant 0 : index
    %c0_84 = arith.constant 0 : index
    %134 = vector.load %arg6[%c12, %c0_83, %c0_84] : memref<18x1x128xbf16, #tpu.memory_space<vmem>>, vector<1x1x128xbf16>
    %135 = vector.shape_cast %134 : vector<1x1x128xbf16> to vector<1x128xbf16>
    %c13 = arith.constant 13 : index
    %c0_85 = arith.constant 0 : index
    %c0_86 = arith.constant 0 : index
    %136 = vector.load %arg6[%c13, %c0_85, %c0_86] : memref<18x1x128xbf16, #tpu.memory_space<vmem>>, vector<1x1x128xbf16>
    %137 = vector.shape_cast %136 : vector<1x1x128xbf16> to vector<1x128xbf16>
    %c14 = arith.constant 14 : index
    %c0_87 = arith.constant 0 : index
    %c0_88 = arith.constant 0 : index
    %138 = vector.load %arg6[%c14, %c0_87, %c0_88] : memref<18x1x128xbf16, #tpu.memory_space<vmem>>, vector<1x1x128xbf16>
    %139 = vector.shape_cast %138 : vector<1x1x128xbf16> to vector<1x128xbf16>
    %140 = vector.broadcast %139 : vector<1x128xbf16> to vector<16x128xbf16>
    %141 = arith.mulf %140, %133 : vector<16x128xbf16>
    %142 = math.tanh %141 : vector<16x128xbf16>
    %143 = vector.broadcast %137 : vector<1x128xbf16> to vector<16x128xbf16>
    %144 = arith.mulf %143, %142 : vector<16x128xbf16>
    %145 = vector.broadcast %135 : vector<1x128xbf16> to vector<16x128xbf16>
    %146 = arith.addf %145, %144 : vector<16x128xbf16>
    %147 = arith.mulf %133, %146 : vector<16x128xbf16>
    %c5_89 = arith.constant 5 : index
    %c0_90 = arith.constant 0 : index
    %c0_91 = arith.constant 0 : index
    %148 = vector.load %arg4[%c5_89, %c0_90, %c0_91] : memref<6x128x128xbf16, #tpu.memory_space<vmem>>, vector<1x128x128xbf16>
    %149 = vector.shape_cast %148 : vector<1x128x128xbf16> to vector<128x128xbf16>
    %cst_92 = arith.constant dense<0.000000e+00> : vector<16x128xf32>
    %150 = tpu.matmul %147, %149, %cst_92 {dimension_numbers = #tpu.dot_dimension_numbers<[1], [0], [0], [1], [0, 0, 1, 1], [], []>} : vector<16x128xbf16>, vector<128x128xbf16>, vector<16x128xf32> -> vector<16x128xf32>
    %151 = arith.truncf %150 : vector<16x128xf32> to vector<16x128xbf16>
    %c5_93 = arith.constant 5 : index
    %c0_94 = arith.constant 0 : index
    %c0_95 = arith.constant 0 : index
    %152 = vector.load %arg5[%c5_93, %c0_94, %c0_95] : memref<6x1x128xbf16, #tpu.memory_space<vmem>>, vector<1x1x128xbf16>
    %153 = vector.shape_cast %152 : vector<1x1x128xbf16> to vector<1x128xbf16>
    %154 = vector.broadcast %153 : vector<1x128xbf16> to vector<16x128xbf16>
    %155 = arith.addf %151, %154 : vector<16x128xbf16>
    %c15 = arith.constant 15 : index
    %c0_96 = arith.constant 0 : index
    %c0_97 = arith.constant 0 : index
    %156 = vector.load %arg6[%c15, %c0_96, %c0_97] : memref<18x1x128xbf16, #tpu.memory_space<vmem>>, vector<1x1x128xbf16>
    %157 = vector.shape_cast %156 : vector<1x1x128xbf16> to vector<1x128xbf16>
    %c16 = arith.constant 16 : index
    %c0_98 = arith.constant 0 : index
    %c0_99 = arith.constant 0 : index
    %158 = vector.load %arg6[%c16, %c0_98, %c0_99] : memref<18x1x128xbf16, #tpu.memory_space<vmem>>, vector<1x1x128xbf16>
    %159 = vector.shape_cast %158 : vector<1x1x128xbf16> to vector<1x128xbf16>
    %c17 = arith.constant 17 : index
    %c0_100 = arith.constant 0 : index
    %c0_101 = arith.constant 0 : index
    %160 = vector.load %arg6[%c17, %c0_100, %c0_101] : memref<18x1x128xbf16, #tpu.memory_space<vmem>>, vector<1x1x128xbf16>
    %161 = vector.shape_cast %160 : vector<1x1x128xbf16> to vector<1x128xbf16>
    %162 = vector.broadcast %161 : vector<1x128xbf16> to vector<16x128xbf16>
    %163 = arith.mulf %162, %155 : vector<16x128xbf16>
    %164 = math.tanh %163 : vector<16x128xbf16>
    %165 = vector.broadcast %159 : vector<1x128xbf16> to vector<16x128xbf16>
    %166 = arith.mulf %165, %164 : vector<16x128xbf16>
    %167 = vector.broadcast %157 : vector<1x128xbf16> to vector<16x128xbf16>
    %168 = arith.addf %167, %166 : vector<16x128xbf16>
    %169 = arith.mulf %155, %168 : vector<16x128xbf16>
    %170 = arith.addf %169, %125 : vector<16x128xbf16>
    %c6_102 = arith.constant 6 : index
    %c0_103 = arith.constant 0 : index
    %c0_104 = arith.constant 0 : index
    %171 = vector.load %arg7[%c6_102, %c0_103, %c0_104] : memref<9x1x128xbf16, #tpu.memory_space<vmem>>, vector<1x1x128xbf16>
    %172 = vector.shape_cast %171 : vector<1x1x128xbf16> to vector<1x128xbf16>
    %c7_105 = arith.constant 7 : index
    %c0_106 = arith.constant 0 : index
    %c0_107 = arith.constant 0 : index
    %173 = vector.load %arg7[%c7_105, %c0_106, %c0_107] : memref<9x1x128xbf16, #tpu.memory_space<vmem>>, vector<1x1x128xbf16>
    %174 = vector.shape_cast %173 : vector<1x1x128xbf16> to vector<1x128xbf16>
    %c8_108 = arith.constant 8 : index
    %c0_109 = arith.constant 0 : index
    %c0_110 = arith.constant 0 : index
    %175 = vector.load %arg7[%c8_108, %c0_109, %c0_110] : memref<9x1x128xbf16, #tpu.memory_space<vmem>>, vector<1x1x128xbf16>
    %176 = vector.shape_cast %175 : vector<1x1x128xbf16> to vector<1x128xbf16>
    %177 = vector.broadcast %176 : vector<1x128xbf16> to vector<16x128xbf16>
    %178 = arith.mulf %177, %170 : vector<16x128xbf16>
    %179 = math.tanh %178 : vector<16x128xbf16>
    %180 = vector.broadcast %174 : vector<1x128xbf16> to vector<16x128xbf16>
    %181 = arith.mulf %180, %179 : vector<16x128xbf16>
    %182 = vector.broadcast %172 : vector<1x128xbf16> to vector<16x128xbf16>
    %183 = arith.addf %182, %181 : vector<16x128xbf16>
    %184 = arith.mulf %170, %183 : vector<16x128xbf16>
    %c0_111 = arith.constant 0 : index
    %c0_112 = arith.constant 0 : index
    %185 = vector.load %arg8[%c0_111, %c0_112] : memref<128x32xbf16, #tpu.memory_space<vmem>>, vector<128x32xbf16>
    %cst_113 = arith.constant dense<0.000000e+00> : vector<16x32xf32>
    %186 = tpu.matmul %184, %185, %cst_113 {dimension_numbers = #tpu.dot_dimension_numbers<[1], [0], [0], [1], [0, 0, 1, 1], [], []>} : vector<16x128xbf16>, vector<128x32xbf16>, vector<16x32xf32> -> vector<16x32xf32>
    %187 = arith.truncf %186 : vector<16x32xf32> to vector<16x32xbf16>
    %c0_114 = arith.constant 0 : index
    %c0_115 = arith.constant 0 : index
    %188 = vector.load %arg9[%c0_114, %c0_115] : memref<1x32xbf16, #tpu.memory_space<vmem>>, vector<1x32xbf16>
    %189 = vector.broadcast %188 : vector<1x32xbf16> to vector<16x32xbf16>
    %190 = arith.addf %187, %189 : vector<16x32xbf16>
    %c0_116 = arith.constant 0 : index
    %c0_117 = arith.constant 0 : index
    %c0_118 = arith.constant 0 : index
    %191 = vector.load %arg10[%c0_116, %c0_117, %c0_118] : memref<3x1x32xbf16, #tpu.memory_space<vmem>>, vector<1x1x32xbf16>
    %192 = vector.shape_cast %191 : vector<1x1x32xbf16> to vector<1x32xbf16>
    %c1_119 = arith.constant 1 : index
    %c0_120 = arith.constant 0 : index
    %c0_121 = arith.constant 0 : index
    %193 = vector.load %arg10[%c1_119, %c0_120, %c0_121] : memref<3x1x32xbf16, #tpu.memory_space<vmem>>, vector<1x1x32xbf16>
    %194 = vector.shape_cast %193 : vector<1x1x32xbf16> to vector<1x32xbf16>
    %c2_122 = arith.constant 2 : index
    %c0_123 = arith.constant 0 : index
    %c0_124 = arith.constant 0 : index
    %195 = vector.load %arg10[%c2_122, %c0_123, %c0_124] : memref<3x1x32xbf16, #tpu.memory_space<vmem>>, vector<1x1x32xbf16>
    %196 = vector.shape_cast %195 : vector<1x1x32xbf16> to vector<1x32xbf16>
    %197 = vector.broadcast %196 : vector<1x32xbf16> to vector<16x32xbf16>
    %198 = arith.mulf %197, %190 : vector<16x32xbf16>
    %199 = math.tanh %198 : vector<16x32xbf16>
    %200 = vector.broadcast %194 : vector<1x32xbf16> to vector<16x32xbf16>
    %201 = arith.mulf %200, %199 : vector<16x32xbf16>
    %202 = vector.broadcast %192 : vector<1x32xbf16> to vector<16x32xbf16>
    %203 = arith.addf %202, %201 : vector<16x32xbf16>
    %204 = arith.mulf %190, %203 : vector<16x32xbf16>
    %205 = arith.extf %204 : vector<16x32xbf16> to vector<16x32xf32>
    %cst_125 = arith.constant dense<0.000000e+00> : vector<16xf32>
    %206 = vector.multi_reduction <add>, %205, %cst_125 [1] : vector<16x32xf32> to vector<16xf32>
    %207 = vector.shape_cast %206 : vector<16xf32> to vector<16x1xf32>
    %cst_126 = arith.constant 3.200000e+01 : f32
    %208 = vector.broadcast %cst_126 : f32 to vector<16x1xf32>
    %209 = arith.divf %207, %208 : vector<16x1xf32>
    %210 = vector.broadcast %209 : vector<16x1xf32> to vector<16x32xf32>
    %211 = arith.subf %205, %210 : vector<16x32xf32>
    %212 = arith.mulf %211, %211 : vector<16x32xf32>
    %cst_127 = arith.constant dense<0.000000e+00> : vector<16xf32>
    %213 = vector.multi_reduction <add>, %212, %cst_127 [1] : vector<16x32xf32> to vector<16xf32>
    %214 = vector.shape_cast %213 : vector<16xf32> to vector<16x1xf32>
    %cst_128 = arith.constant 3.200000e+01 : f32
    %215 = vector.broadcast %cst_128 : f32 to vector<16x1xf32>
    %216 = arith.divf %214, %215 : vector<16x1xf32>
    %217 = vector.broadcast %209 : vector<16x1xf32> to vector<16x32xf32>
    %218 = arith.subf %205, %217 : vector<16x32xf32>
    %cst_129 = arith.constant 9.99999974E-6 : f32
    %219 = vector.broadcast %cst_129 : f32 to vector<16x1xf32>
    %220 = arith.addf %216, %219 : vector<16x1xf32>
    %221 = math.rsqrt %220 : vector<16x1xf32>
    %222 = vector.broadcast %221 : vector<16x1xf32> to vector<16x32xf32>
    %223 = arith.mulf %218, %222 : vector<16x32xf32>
    %c0_130 = arith.constant 0 : index
    %c0_131 = arith.constant 0 : index
    %224 = vector.load %arg11[%c0_130, %c0_131] : memref<1x32xf32, #tpu.memory_space<vmem>>, vector<1x32xf32>
    %225 = vector.broadcast %224 : vector<1x32xf32> to vector<16x32xf32>
    %226 = arith.mulf %223, %225 : vector<16x32xf32>
    %c0_132 = arith.constant 0 : index
    %c0_133 = arith.constant 0 : index
    %227 = vector.load %arg12[%c0_132, %c0_133] : memref<1x32xf32, #tpu.memory_space<vmem>>, vector<1x32xf32>
    %228 = vector.broadcast %227 : vector<1x32xf32> to vector<16x32xf32>
    %229 = arith.addf %226, %228 : vector<16x32xf32>
    %230 = arith.truncf %229 : vector<16x32xf32> to vector<16x32xbf16>
    %c0_134 = arith.constant 0 : index
    %c0_135 = arith.constant 0 : index
    %231 = vector.load %arg13[%c0_134, %c0_135] : memref<32x384xbf16, #tpu.memory_space<vmem>>, vector<32x384xbf16>
    %cst_136 = arith.constant dense<0.000000e+00> : vector<16x384xf32>
    %232 = tpu.matmul %230, %231, %cst_136 {dimension_numbers = #tpu.dot_dimension_numbers<[1], [0], [0], [1], [0, 0, 1, 1], [], []>} : vector<16x32xbf16>, vector<32x384xbf16>, vector<16x384xf32> -> vector<16x384xf32>
    %233 = arith.truncf %232 : vector<16x384xf32> to vector<16x384xbf16>
    %c0_137 = arith.constant 0 : index
    %c0_138 = arith.constant 0 : index
    %234 = vector.load %arg14[%c0_137, %c0_138] : memref<1x384xbf16, #tpu.memory_space<vmem>>, vector<1x384xbf16>
    %235 = vector.broadcast %234 : vector<1x384xbf16> to vector<16x384xbf16>
    %236 = arith.addf %233, %235 : vector<16x384xbf16>
    %237 = vector.extract_strided_slice %236 {offsets = [0, 0], sizes = [16, 128], strides = [1, 1]} : vector<16x384xbf16> to vector<16x128xbf16>
    %238 = vector.extract_strided_slice %236 {offsets = [0, 128], sizes = [16, 128], strides = [1, 1]} : vector<16x384xbf16> to vector<16x128xbf16>
    %239 = vector.extract_strided_slice %236 {offsets = [0, 256], sizes = [16, 128], strides = [1, 1]} : vector<16x384xbf16> to vector<16x128xbf16>
    %240 = arith.mulf %237, %238 : vector<16x128xbf16>
    %c0_139 = arith.constant 0 : index
    %c0_140 = arith.constant 0 : index
    %241 = vector.load %arg15[%c0_139, %c0_140] : memref<128x16xbf16, #tpu.memory_space<vmem>>, vector<128x16xbf16>
    %cst_141 = arith.constant dense<0.000000e+00> : vector<16x16xf32>
    %242 = tpu.matmul %240, %241, %cst_141 {dimension_numbers = #tpu.dot_dimension_numbers<[1], [0], [0], [1], [0, 0, 1, 1], [], []>} : vector<16x128xbf16>, vector<128x16xbf16>, vector<16x16xf32> -> vector<16x16xf32>
    %cst_142 = arith.constant dense<0xFF800000> : vector<16xf32>
    %243 = vector.multi_reduction <maximumf>, %242, %cst_142 [1] : vector<16x16xf32> to vector<16xf32>
    %244 = vector.shape_cast %243 : vector<16xf32> to vector<16x1xf32>
    %245 = vector.broadcast %244 : vector<16x1xf32> to vector<16x16xf32>
    %246 = arith.subf %242, %245 : vector<16x16xf32>
    %247 = math.exp %246 : vector<16x16xf32>
    %c0_143 = arith.constant 0 : index
    %c0_144 = arith.constant 0 : index
    %248 = vector.load %arg16[%c0_143, %c0_144] : memref<16x16xbf16, #tpu.memory_space<vmem>>, vector<16x16xbf16>
    %249 = arith.truncf %247 : vector<16x16xf32> to vector<16x16xbf16>
    %cst_145 = arith.constant dense<0.000000e+00> : vector<16x16xf32>
    %250 = tpu.matmul %249, %248, %cst_145 {dimension_numbers = #tpu.dot_dimension_numbers<[1], [0], [0], [1], [0, 0, 1, 1], [], []>} : vector<16x16xbf16>, vector<16x16xbf16>, vector<16x16xf32> -> vector<16x16xf32>
    %251 = tpu.reciprocal %250 {approx = true} : vector<16x16xf32> -> vector<16x16xf32>
    %252 = arith.mulf %247, %251 : vector<16x16xf32>
    %c0_146 = arith.constant 0 : index
    %c0_147 = arith.constant 0 : index
    %253 = vector.load %arg17[%c0_146, %c0_147] : memref<16x128xbf16, #tpu.memory_space<vmem>>, vector<16x128xbf16>
    %254 = arith.truncf %252 : vector<16x16xf32> to vector<16x16xbf16>
    %cst_148 = arith.constant dense<0.000000e+00> : vector<16x128xf32>
    %255 = tpu.matmul %254, %253, %cst_148 {dimension_numbers = #tpu.dot_dimension_numbers<[1], [0], [0], [1], [0, 0, 1, 1], [], []>} : vector<16x16xbf16>, vector<16x128xbf16>, vector<16x128xf32> -> vector<16x128xf32>
    %256 = arith.truncf %255 : vector<16x128xf32> to vector<16x128xbf16>
    %257 = arith.mulf %256, %239 : vector<16x128xbf16>
    %c0_149 = arith.constant 0 : index
    %c0_150 = arith.constant 0 : index
    %258 = vector.load %arg18[%c0_149, %c0_150] : memref<128x32xbf16, #tpu.memory_space<vmem>>, vector<128x32xbf16>
    %cst_151 = arith.constant dense<0.000000e+00> : vector<16x32xf32>
    %259 = tpu.matmul %257, %258, %cst_151 {dimension_numbers = #tpu.dot_dimension_numbers<[1], [0], [0], [1], [0, 0, 1, 1], [], []>} : vector<16x128xbf16>, vector<128x32xbf16>, vector<16x32xf32> -> vector<16x32xf32>
    %260 = arith.truncf %259 : vector<16x32xf32> to vector<16x32xbf16>
    %261 = arith.addf %260, %204 : vector<16x32xbf16>
    %c0_152 = arith.constant 0 : index
    %c0_153 = arith.constant 0 : index
    %262 = vector.load %arg19[%c0_152, %c0_153] : memref<32x32xbf16, #tpu.memory_space<vmem>>, vector<32x32xbf16>
    %cst_154 = arith.constant dense<0.000000e+00> : vector<16x32xf32>
    %263 = tpu.matmul %261, %262, %cst_154 {dimension_numbers = #tpu.dot_dimension_numbers<[1], [0], [0], [1], [0, 0, 1, 1], [], []>} : vector<16x32xbf16>, vector<32x32xbf16>, vector<16x32xf32> -> vector<16x32xf32>
    %264 = arith.truncf %263 : vector<16x32xf32> to vector<16x32xbf16>
    %c0_155 = arith.constant 0 : index
    %c0_156 = arith.constant 0 : index
    %265 = vector.load %arg20[%c0_155, %c0_156] : memref<1x32xbf16, #tpu.memory_space<vmem>>, vector<1x32xbf16>
    %266 = vector.broadcast %265 : vector<1x32xbf16> to vector<16x32xbf16>
    %267 = arith.addf %264, %266 : vector<16x32xbf16>
    %c0_157 = arith.constant 0 : index
    %c0_158 = arith.constant 0 : index
    %c0_159 = arith.constant 0 : index
    %268 = vector.load %arg21[%c0_157, %c0_158, %c0_159] : memref<3x1x32xbf16, #tpu.memory_space<vmem>>, vector<1x1x32xbf16>
    %269 = vector.shape_cast %268 : vector<1x1x32xbf16> to vector<1x32xbf16>
    %c1_160 = arith.constant 1 : index
    %c0_161 = arith.constant 0 : index
    %c0_162 = arith.constant 0 : index
    %270 = vector.load %arg21[%c1_160, %c0_161, %c0_162] : memref<3x1x32xbf16, #tpu.memory_space<vmem>>, vector<1x1x32xbf16>
    %271 = vector.shape_cast %270 : vector<1x1x32xbf16> to vector<1x32xbf16>
    %c2_163 = arith.constant 2 : index
    %c0_164 = arith.constant 0 : index
    %c0_165 = arith.constant 0 : index
    %272 = vector.load %arg21[%c2_163, %c0_164, %c0_165] : memref<3x1x32xbf16, #tpu.memory_space<vmem>>, vector<1x1x32xbf16>
    %273 = vector.shape_cast %272 : vector<1x1x32xbf16> to vector<1x32xbf16>
    %274 = vector.broadcast %273 : vector<1x32xbf16> to vector<16x32xbf16>
    %275 = arith.mulf %274, %267 : vector<16x32xbf16>
    %276 = math.tanh %275 : vector<16x32xbf16>
    %277 = vector.broadcast %271 : vector<1x32xbf16> to vector<16x32xbf16>
    %278 = arith.mulf %277, %276 : vector<16x32xbf16>
    %279 = vector.broadcast %269 : vector<1x32xbf16> to vector<16x32xbf16>
    %280 = arith.addf %279, %278 : vector<16x32xbf16>
    %281 = arith.mulf %267, %280 : vector<16x32xbf16>
    %282 = arith.addf %281, %261 : vector<16x32xbf16>
    %c0_166 = arith.constant 0 : index
    %c0_167 = arith.constant 0 : index
    %283 = vector.load %arg22[%c0_166, %c0_167] : memref<32x128xbf16, #tpu.memory_space<vmem>>, vector<32x128xbf16>
    %cst_168 = arith.constant dense<0.000000e+00> : vector<16x128xf32>
    %284 = tpu.matmul %282, %283, %cst_168 {dimension_numbers = #tpu.dot_dimension_numbers<[1], [0], [0], [1], [0, 0, 1, 1], [], []>} : vector<16x32xbf16>, vector<32x128xbf16>, vector<16x128xf32> -> vector<16x128xf32>
    %c0_169 = arith.constant 0 : index
    %c0_170 = arith.constant 0 : index
    %285 = vector.load %arg23[%c0_169, %c0_170] : memref<1x128xf32, #tpu.memory_space<vmem>>, vector<1x128xf32>
    %286 = vector.broadcast %285 : vector<1x128xf32> to vector<16x128xf32>
    %287 = arith.addf %284, %286 : vector<16x128xf32>
    %c0_171 = arith.constant 0 : index
    %c0_172 = arith.constant 0 : index
    %288 = vector.load %arg24[%c0_171, %c0_172] : memref<16x128xf32, #tpu.memory_space<vmem>>, vector<16x128xf32>
    tpu.vector_store %arg24[%c0_171, %c0_172], %287 {strides = array<i32>} : memref<16x128xf32, #tpu.memory_space<vmem>>, vector<16x128xf32>,
    return
  }
  func.func @transform_0(%arg0: i32) -> (i32, i32) {
    %c0_i32 = arith.constant 0 : i32
    %c0_i32_0 = arith.constant 0 : i32
    return %arg0, %c0_i32 : i32, i32
  }
  func.func @transform_1(%arg0: i32) -> (i32, i32) {
    %c0_i32 = arith.constant 0 : i32
    %c0_i32_0 = arith.constant 0 : i32
    %c0_i32_1 = arith.constant 0 : i32
    return %c0_i32, %c0_i32_0 : i32, i32
  }
  func.func @transform_2(%arg0: i32) -> (i32, i32) {
    %c0_i32 = arith.constant 0 : i32
    %c0_i32_0 = arith.constant 0 : i32
    %c0_i32_1 = arith.constant 0 : i32
    return %c0_i32, %c0_i32_0 : i32, i32
  }
  func.func @transform_3(%arg0: i32) -> (i32, i32, i32) {
    %c0_i32 = arith.constant 0 : i32
    %c0_i32_0 = arith.constant 0 : i32
    %c0_i32_1 = arith.constant 0 : i32
    %c0_i32_2 = arith.constant 0 : i32
    return %c0_i32, %c0_i32_0, %c0_i32_1 : i32, i32, i32
  }
  func.func @transform_4(%arg0: i32) -> (i32, i32, i32) {
    %c0_i32 = arith.constant 0 : i32
    %c0_i32_0 = arith.constant 0 : i32
    %c0_i32_1 = arith.constant 0 : i32
    %c0_i32_2 = arith.constant 0 : i32
    return %c0_i32, %c0_i32_0, %c0_i32_1 : i32, i32, i32
  }
  func.func @transform_5(%arg0: i32) -> (i32, i32, i32) {
    %c0_i32 = arith.constant 0 : i32
    %c0_i32_0 = arith.constant 0 : i32
    %c0_i32_1 = arith.constant 0 : i32
    %c0_i32_2 = arith.constant 0 : i32
    return %c0_i32, %c0_i32_0, %c0_i32_1 : i32, i32, i32
  }
  func.func @transform_6(%arg0: i32) -> (i32, i32, i32) {
    %c0_i32 = arith.constant 0 : i32
    %c0_i32_0 = arith.constant 0 : i32
    %c0_i32_1 = arith.constant 0 : i32
    %c0_i32_2 = arith.constant 0 : i32
    return %c0_i32, %c0_i32_0, %c0_i32_1 : i32, i32, i32
  }
  func.func @transform_7(%arg0: i32) -> (i32, i32) {
    %c0_i32 = arith.constant 0 : i32
    %c0_i32_0 = arith.constant 0 : i32
    %c0_i32_1 = arith.constant 0 : i32
    return %c0_i32, %c0_i32_0 : i32, i32
  }
  func.func @transform_8(%arg0: i32) -> (i32, i32) {
    %c0_i32 = arith.constant 0 : i32
    %c0_i32_0 = arith.constant 0 : i32
    %c0_i32_1 = arith.constant 0 : i32
    return %c0_i32, %c0_i32_0 : i32, i32
  }
  func.func @transform_9(%arg0: i32) -> (i32, i32, i32) {
    %c0_i32 = arith.constant 0 : i32
    %c0_i32_0 = arith.constant 0 : i32
    %c0_i32_1 = arith.constant 0 : i32
    %c0_i32_2 = arith.constant 0 : i32
    return %c0_i32, %c0_i32_0, %c0_i32_1 : i32, i32, i32
  }
  func.func @transform_10(%arg0: i32) -> (i32, i32) {
    %c0_i32 = arith.constant 0 : i32
    %c0_i32_0 = arith.constant 0 : i32
    %c0_i32_1 = arith.constant 0 : i32
    return %c0_i32, %c0_i32_0 : i32, i32
  }
  func.func @transform_11(%arg0: i32) -> (i32, i32) {
    %c0_i32 = arith.constant 0 : i32
    %c0_i32_0 = arith.constant 0 : i32
    %c0_i32_1 = arith.constant 0 : i32
    return %c0_i32, %c0_i32_0 : i32, i32
  }
  func.func @transform_12(%arg0: i32) -> (i32, i32) {
    %c0_i32 = arith.constant 0 : i32
    %c0_i32_0 = arith.constant 0 : i32
    %c0_i32_1 = arith.constant 0 : i32
    return %c0_i32, %c0_i32_0 : i32, i32
  }
  func.func @transform_13(%arg0: i32) -> (i32, i32) {
    %c0_i32 = arith.constant 0 : i32
    %c0_i32_0 = arith.constant 0 : i32
    %c0_i32_1 = arith.constant 0 : i32
    return %c0_i32, %c0_i32_0 : i32, i32
  }
  func.func @transform_14(%arg0: i32) -> (i32, i32) {
    %c0_i32 = arith.constant 0 : i32
    %c0_i32_0 = arith.constant 0 : i32
    %c0_i32_1 = arith.constant 0 : i32
    return %c0_i32, %c0_i32_0 : i32, i32
  }
  func.func @transform_15(%arg0: i32) -> (i32, i32) {
    %c0_i32 = arith.constant 0 : i32
    %c0_i32_0 = arith.constant 0 : i32
    %c0_i32_1 = arith.constant 0 : i32
    return %c0_i32, %c0_i32_0 : i32, i32
  }
  func.func @transform_16(%arg0: i32) -> (i32, i32) {
    %c0_i32 = arith.constant 0 : i32
    %c0_i32_0 = arith.constant 0 : i32
    %c0_i32_1 = arith.constant 0 : i32
    return %c0_i32, %c0_i32_0 : i32, i32
  }
  func.func @transform_17(%arg0: i32) -> (i32, i32) {
    %c0_i32 = arith.constant 0 : i32
    %c0_i32_0 = arith.constant 0 : i32
    %c0_i32_1 = arith.constant 0 : i32
    return %c0_i32, %c0_i32_0 : i32, i32
  }
  func.func @transform_18(%arg0: i32) -> (i32, i32) {
    %c0_i32 = arith.constant 0 : i32
    %c0_i32_0 = arith.constant 0 : i32
    %c0_i32_1 = arith.constant 0 : i32
    return %c0_i32, %c0_i32_0 : i32, i32
  }
  func.func @transform_19(%arg0: i32) -> (i32, i32) {
    %c0_i32 = arith.constant 0 : i32
    %c0_i32_0 = arith.constant 0 : i32
    %c0_i32_1 = arith.constant 0 : i32
    return %c0_i32, %c0_i32_0 : i32, i32
  }
  func.func @transform_20(%arg0: i32) -> (i32, i32, i32) {
    %c0_i32 = arith.constant 0 : i32
    %c0_i32_0 = arith.constant 0 : i32
    %c0_i32_1 = arith.constant 0 : i32
    %c0_i32_2 = arith.constant 0 : i32
    return %c0_i32, %c0_i32_0, %c0_i32_1 : i32, i32, i32
  }
  func.func @transform_21(%arg0: i32) -> (i32, i32) {
    %c0_i32 = arith.constant 0 : i32
    %c0_i32_0 = arith.constant 0 : i32
    %c0_i32_1 = arith.constant 0 : i32
    return %c0_i32, %c0_i32_0 : i32, i32
  }
  func.func @transform_22(%arg0: i32) -> (i32, i32) {
    %c0_i32 = arith.constant 0 : i32
    %c0_i32_0 = arith.constant 0 : i32
    %c0_i32_1 = arith.constant 0 : i32
    return %c0_i32, %c0_i32_0 : i32, i32
  }
  func.func @transform_23(%arg0: i32) -> (i32, i32) {
    %c0_i32 = arith.constant 0 : i32
    %c0_i32_0 = arith.constant 0 : i32
    return %arg0, %c0_i32 : i32, i32
  }
}

</mosaic_0001>

<bundles_post_ra>
// kernel: _trf_forward.1
= control target key start
LH: loop header
LB: loop body
LE: loop exit
PB: predicated region body
PF: predicated region fallthrough
CT: control target
= control target key end

     0   :  { %s2942_s0 = inlined_call_operand.vmem [shape: f32[16,8], index: 0, kind: input, shape index: {}]   ;;  %s2943_s1 = inlined_call_operand.vmem [shape: bf16[8,128], index: 1, kind: input, shape index: {}]   ;;  %s2944_s2 = inlined_call_operand.vmem [shape: bf16[1,128], index: 2, kind: input, shape index: {}]   ;;  %s2945_s3 = inlined_call_operand.hbm [shape: bf16[6,128,128], index: 3, kind: input, shape index: {}]   ;;  %s2946_s4 = inlined_call_operand.vmem [shape: bf16[6,1,128], index: 4, kind: input, shape index: {}]   ;;  %s2947_s5 = inlined_call_operand.vmem [shape: bf16[18,1,128], index: 5, kind: input, shape index: {}]   ;;  %s2948_s6 = inlined_call_operand.vmem [shape: bf16[9,1,128], index: 6, kind: input, shape index: {}]   ;;  %s2949_s7 = inlined_call_operand.vmem [shape: bf16[128,32], index: 7, kind: input, shape index: {}]   ;;  %s2950_s8 = inlined_call_operand.vmem [shape: bf16[1,32], index: 8, kind: input, shape index: {}]   ;;  %s2951_s9 = inlined_call_operand.vmem [shape: bf16[3,1,32], index: 9, kind: input, shape index: {}]   ;;  %s2952_s10 = inlined_call_operand.vmem [shape: f32[1,32], index: 10, kind: input, shape index: {}]   ;;  %s2953_s11 = inlined_call_operand.vmem [shape: f32[1,32], index: 11, kind: input, shape index: {}]   ;;  %s2954_s12 = inlined_call_operand.vmem [shape: bf16[32,384], index: 12, kind: input, shape index: {}]   ;;  %s2955_s13 = inlined_call_operand.vmem [shape: bf16[1,384], index: 13, kind: input, shape index: {}]   ;;  %s2956_s14 = inlined_call_operand.vmem [shape: bf16[128,16], index: 14, kind: input, shape index: {}]   ;;  %s2957_s15 = inlined_call_operand.vmem [shape: bf16[16,16], index: 15, kind: input, shape index: {}]   ;;  %s2958_s16 = inlined_call_operand.vmem [shape: bf16[16,128], index: 16, kind: input, shape index: {}]   ;;  %s2959_s17 = inlined_call_operand.vmem [shape: bf16[128,32], index: 17, kind: input, shape index: {}]   ;;  %s2960_s18 = inlined_call_operand.vmem [shape: bf16[32,32], index: 18, kind: input, shape index: {}]   ;;  %s2961_s19 = inlined_call_operand.vmem [shape: bf16[1,32], index: 19, kind: input, shape index: {}]   ;;  %s2962_s20 = inlined_call_operand.vmem [shape: bf16[3,1,32], index: 20, kind: input, shape index: {}]   ;;  %s2963_s21 = inlined_call_operand.vmem [shape: bf16[32,128], index: 21, kind: input, shape index: {}]   ;;  %s2964_s22 = inlined_call_operand.vmem [shape: f32[1,128], index: 22, kind: input, shape index: {}]   ;;  %s2965_s23 = inlined_call_operand.vmem [shape: f32[16,128], index: 23, kind: output, shape index: {}]  }
   0x1   :  { %2971 = sst [smem:[#allocation5_spill]] %s2942_s0 }
   0x2   :  { %2972 = sst [smem:[#allocation6_spill]] %s2943_s1 }
   0x3   :  { %2973 = sst [smem:[#allocation7_spill]] %s2944_s2 }
   0x4   :  { %2974 = sst [smem:[#allocation8_spill]] %s2945_s3 }
   0x5   :  { %2975 = sst [smem:[#allocation9_spill]] %s2946_s4 }
   0x6   :  { %2976 = sst [smem:[#allocation10_spill]] %s2947_s5 }
   0x7   :  { %2977 = sst [smem:[#allocation11_spill]] %s2948_s6 }
   0x8   :  { %2978 = sst [smem:[#allocation12_spill]] %s2949_s7 }
   0x9   :  { %28 = vsyncpa [#allocation3], 0  ;;  %s2979_s24 = sld [smem:[#allocation8_spill]]  ;;  %s2481_s5 = smov [#allocation2]  }
   0xa   :  { %s41_s1 = sshll.u32 %s2481_s5, 4  ;;  %s2482_s26 = smov 64   ;;  %s42_s1 = int_to_ptr.vmem [resolvable:$true] %s41_s1 }
   0xb   :  { %s2483_s2 = smov 4  }
   0xf   :  { %s39_s25 = sshll.u32 %s2979_s24, 4  ;;  %s40_s25 = int_to_ptr.hbm [resolvable:$true] %s39_s25 }
  0x10   :  { %47 = dma.hbm_to_vmem [thread:$0]  %s40_s25, 6144, %s42_s1, [#allocation3], %s2482_s26, %s2482_s26, %s2483_s2  }
  0x11   :  { %2479 = dma.done.wait [#allocation3], 6144  }
  0x12   :  { %2480 = vsyncadd [#allocation3], 4294961152  ;;  %vm99_vm0 = vcmask 1043456   ;;  %s2980_s7 = sld [smem:[#allocation6_spill]]  ;;  %vm95_vm1 = vcmask 64512   ;;  %v2313_v5 = vld [vmem:[#allocation2 + $0x38] sm:$0xff] }
  0x13   :  { %s2981_s3 = sld [smem:[#allocation5_spill]]  ;;  %201 = vmatpush.bf16.msra.mxu1 %v2313_v5  ;;  %v2312_v6 = vld [vmem:[#allocation2 + $0x30] sm:$0xff]  ;;  %v2311_v7 = vld [vmem:[#allocation2 + $0x28] sm:$0xff]  ;;  %v2310_v8 = vld [vmem:[#allocation2 + $0x20] sm:$0xff]  ;;  %vm1332_vm2 = vcmask 261120   ;;  %vm1611_vm10 = vcmask 130048  }
  0x14   :  { %v2309_v9 = vld [vmem:[#allocation2 + $0x18] sm:$0xff]  ;;  %v2308_v10 = vld [vmem:[#allocation2 + $0x10] sm:$0xff]  ;;  %v2307_v11 = vld [vmem:[#allocation2 + $0x8] sm:$0xff]  ;;  %s2982_s25 = sld [smem:[#allocation7_spill]] }
  0x15   :  { %v2306_v12 = vld [vmem:[#allocation2] sm:$0xff]  ;;  %v2321_v30 = vld [vmem:[#allocation2 + $0x78] sm:$0xff]  ;;  %s2983_s26 = sld [smem:[#allocation9_spill]]  ;;  %v2320_v32 = vld [vmem:[#allocation2 + $0x70] sm:$0xff] }
  0x16   :  { %343 = vmatpush.bf16.msra.mxu2 %v2321_v30  ;;  %v2319_v34 = vld [vmem:[#allocation2 + $0x68] sm:$0xff]  ;;  %s2984_s27 = sld [smem:[#allocation10_spill]]  ;;  %v2318_v38 = vld [vmem:[#allocation2 + $0x60] sm:$0xff]  ;;  %v2317_v42 = vld [vmem:[#allocation2 + $0x58] sm:$0xff] }
  0x17   :  { %202 = vmatpush.bf16.msra.mxu1 %v2312_v6  ;;  %v2316_v46 = vld [vmem:[#allocation2 + $0x50] sm:$0xff]  ;;  %v2315_v52 = vld [vmem:[#allocation2 + $0x48] sm:$0xff]  ;;  %v2314_v57 = vld [vmem:[#allocation2 + $0x40] sm:$0xff]  ;;  %s2985_s28 = sld [smem:[#allocation11_spill]] }
  0x18   :  { %v93_v0 = vld [vmem:[%s2980_s7] sm:$0xf]  ;;  %s2986_s5 = sld [smem:[#allocation12_spill]] }
  0x19   :  { %v91_v1 = vld [vmem:[%s2981_s3] sm:$0xff]  ;;  %v92_v2 = vld [vmem:[%s2981_s3 + $0x8] sm:$0xff]  ;;  %v101_v3 = vsel %vm99_vm0, %v93_v0, 0 }
  0x1a   :  { %v94_v4 = vpack.c.bf16 %v92_v2, %v91_v1  ;;  %110 = vmatpush.bf16.msra.mxu0 %v101_v3  ;;  %v119_v13 = vld [vmem:[%s2982_s25] sm:$0x1]  ;;  %344 = vmatpush.bf16.msra.mxu2 %v2320_v32 }
  0x1b   :  { %203 = vmatpush.bf16.msra.mxu1 %v2311_v7  ;;  %v121_v14 = vpack.i.b16 %v119_v13, %v119_v13  ;;  %v217_v31 = vld [vmem:[%s2983_s26] sm:$0x1] }
  0x1c   :  { %v219_v33 = vpack.i.b16 %v217_v31, %v217_v31  ;;  %v1962_v35 = vld [vmem:[%s2984_s27 + $0x2] sm:$0x1]  ;;  %v1961_v58 = vld [vmem:[%s2984_s27 + $0x1] sm:$0x1]  ;;  %v229_v2 = vld [vmem:[%s2984_s27] sm:$0x1] }
  0x1d   :  { %1928 = vmatmul.msk.bf16.vlgmr.msra.gmra.mxu0 %vm95_vm1, %v94_v4  ;;  %v123_v17 = vperm.slane %v121_v14, 0  ;;  %v235_v37 = vpack.i.b16 %v1962_v35, %v1962_v35  ;;  %v252_v61 = vpack.i.b16 %v1961_v58, %v1961_v58  ;;  %v263_v7 = vpack.i.b16 %v229_v2, %v229_v2  ;;  %v1995_v31 = vld [vmem:[%s2983_s26 + $0x1] sm:$0x1] }
  0x1e   :  { %v221_v36 = vperm.slane %v219_v33, 0  ;;  %345 = vmatpush.bf16.msra.mxu2 %v2319_v34  ;;  %v362_v32 = vpack.i.b16 %v1995_v31, %v1995_v31  ;;  %v1998_v33 = vld [vmem:[%s2984_s27 + $0x5] sm:$0x1] }
  0x1f   :  { %204 = vmatpush.bf16.msra.mxu1 %v2310_v8  ;;  %v126_v19 = vunpack.c.l.bf16 %v123_v17  ;;  %v237_v44 = vperm.slane %v235_v37, 0  ;;  %v254_v0 = vperm.slane %v252_v61, 0  ;;  %v379_v35 = vpack.i.b16 %v1998_v33, %v1998_v33 }
  0x20   :  { %v224_v41 = vunpack.c.l.bf16 %v221_v36  ;;  %v364_v34 = vperm.slane %v362_v32, 0 }
  0x21   :  { %v238_v48 = vunpack.c.l.bf16 %v237_v44  ;;  %v255_v6 = vunpack.c.l.bf16 %v254_v0 }
  0x22   :  { %346 = vmatpush.bf16.msra.mxu2 %v2318_v38  ;;  %v367_v38 = vunpack.c.l.bf16 %v364_v34 }
  0x23   :  { %205 = vmatpush.bf16.msra.mxu1 %v2309_v9 }
  0x26   :  { %347 = vmatpush.bf16.msra.mxu2 %v2317_v42 }
  0x27   :  { %206 = vmatpush.bf16.msra.mxu1 %v2308_v10  ;;  %v265_v10 = vperm.slane %v263_v7, 0 }
  0x29   :  { %v266_v14 = vunpack.c.l.bf16 %v265_v10 }
  0x2a   :  { %348 = vmatpush.bf16.msra.mxu2 %v2316_v46 }
  0x2b   :  { %207 = vmatpush.bf16.msra.mxu1 %v2307_v11 }
  0x2e   :  { %349 = vmatpush.bf16.msra.mxu2 %v2315_v52 }
  0x2f   :  { %208 = vmatpush.bf16.msra.mxu1 %v2306_v12 }
  0x32   :  { %350 = vmatpush.bf16.msra.mxu2 %v2314_v57 }
  0x9a   :  { %v112_v15 = vpop.f32.mrf.mxu0 }
  0x9b   :  { %v117_v16 = vpack.c.bf16 %v112_v15, %v112_v15 }
  0x9d   :  { %v124_v18 = vunpack.c.l.bf16 %v117_v16 }
  0x9f   :  { %v127_v21 = vadd.f32 %v126_v19, %v124_v18 }
  0xa1   :  { %v2620_v24 = vpack.c.bf16 %v127_v21, %v127_v21 }
  0xa2   :  { %v114_v20 = vpop.f32.mrf.mxu0 }
  0xa3   :  { %v118_v22 = vpack.c.bf16 %v114_v20, %v114_v20  ;;  %v149_v27 = vunpack.c.l.b16 %v2620_v24 }
  0xa5   :  { %v125_v23 = vunpack.c.l.bf16 %v118_v22 }
  0xa7   :  { %v128_v25 = vadd.f32 %v126_v19, %v125_v23 }
  0xa9   :  { %v2622_v26 = vpack.c.bf16 %v128_v25, %v128_v25 }
  0xab   :  { %v150_v28 = vunpack.c.l.b16 %v2622_v26 }
  0xad   :  { %v151_v29 = vpack.c.b16 %v150_v28, %v149_v27 }
  0xaf   :  { %209 = vmatmul.bf16.vlgmr.msra.gmra.mxu1 %v151_v29 }
 0x12c   :  { %v210_v39 = vpop.f32.mrf.mxu1 }
 0x12d   :  { %v215_v40 = vpack.c.bf16 %v210_v39, %v210_v39 }
 0x12f   :  { %v222_v43 = vunpack.c.l.bf16 %v215_v40  ;;  %v381_v40 = vperm.slane %v379_v35, 0  ;;  %v2322_v35 = vld [vmem:[#allocation2 + $0x80] sm:$0xff] }
 0x131   :  { %v225_v45 = vadd.f32 %v224_v41, %v222_v43  ;;  %v382_v43 = vunpack.c.l.bf16 %v381_v40 }
 0x133   :  { %v227_v47 = vpack.c.bf16 %v225_v45, %v225_v45 }
 0x134   :  { %v212_v49 = vpop.f32.mrf.mxu1 }
 0x135   :  { %v239_v50 = vunpack.c.l.bf16 %v227_v47  ;;  %v216_v51 = vpack.c.bf16 %v212_v49, %v212_v49  ;;  %v1997_v49 = vld [vmem:[%s2984_s27 + $0x4] sm:$0x1] }
 0x137   :  { %v241_v53 = vmul.f32 %v239_v50, %v238_v48  ;;  %v223_v54 = vunpack.c.l.bf16 %v216_v51 }
 0x139   :  { %v243_v55 = vpack.c.bf16 %v241_v53, %v241_v53  ;;  %v226_v56 = vadd.f32 %v224_v41, %v223_v54  ;;  %v396_v54 = vpack.i.b16 %v1997_v49, %v1997_v49 }
 0x13b   :  { %v245_v59 = vunpack.c.l.bf16 %v243_v55  ;;  %v228_v60 = vpack.c.bf16 %v226_v56, %v226_v56  ;;  %v1996_v56 = vld [vmem:[%s2984_s27 + $0x3] sm:$0x1]  ;;  %v398_v58 = vperm.slane %v396_v54, 0 }
 0x13c   :  { %v407_v61 = vpack.i.b16 %v1996_v56, %v1996_v56 }
 0x13d   :  { %2397 = vtanh.f32 %v245_v59  ;;  %v240_v62 = vunpack.c.l.bf16 %v228_v60  ;;  %v2329_v59 = vld [vmem:[#allocation2 + $0xb8] sm:$0xff]  ;;  %v399_v2 = vunpack.c.l.bf16 %v398_v58 }
 0x13e   :  { %552 = vmatpush.bf16.msra.mxu3 %v2329_v59 }
 0x13f   :  { %v242_v63 = vmul.f32 %v240_v62, %v238_v48 }
 0x141   :  { %v244_v1 = vpack.c.bf16 %v242_v63, %v242_v63 }
 0x143   :  { %v2398_v3 = vpop.eup %2397  ;;  %v246_v4 = vunpack.c.l.bf16 %v244_v1 }
 0x144   :  { %v249_v5 = vpack.c.bf16 %v2398_v3, %v2398_v3 }
 0x145   :  { %2399 = vtanh.f32 %v246_v4  ;;  %v409_v4 = vperm.slane %v407_v61, 0 }
 0x146   :  { %v256_v8 = vunpack.c.l.bf16 %v249_v5  ;;  %v2327_v5 = vld [vmem:[#allocation2 + $0xa8] sm:$0xff] }
 0x148   :  { %v258_v9 = vmul.f32 %v256_v8, %v255_v6  ;;  %v410_v8 = vunpack.c.l.bf16 %v409_v4 }
 0x14a   :  { %v260_v11 = vpack.c.bf16 %v258_v9, %v258_v9  ;;  %v2326_v9 = vld [vmem:[#allocation2 + $0xa0] sm:$0xff] }
 0x14b   :  { %v2400_v12 = vpop.eup %2399 }
 0x14c   :  { %v250_v13 = vpack.c.bf16 %v2400_v12, %v2400_v12  ;;  %v267_v15 = vunpack.c.l.bf16 %v260_v11 }
 0x14e   :  { %v257_v16 = vunpack.c.l.bf16 %v250_v13  ;;  %v269_v18 = vadd.f32 %v267_v15, %v266_v14  ;;  %v2325_v15 = vld [vmem:[#allocation2 + $0x98] sm:$0xff] }
 0x150   :  { %v259_v17 = vmul.f32 %v257_v16, %v255_v6  ;;  %v271_v21 = vpack.c.bf16 %v269_v18, %v269_v18  ;;  %v2000_v18 = vld [vmem:[%s2985_s28 + $0x2] sm:$0x1] }
 0x152   :  { %v261_v19 = vpack.c.bf16 %v259_v17, %v259_v17  ;;  %v273_v25 = vunpack.c.l.bf16 %v271_v21  ;;  %v2324_v21 = vld [vmem:[#allocation2 + $0x90] sm:$0xff] }
 0x154   :  { %v268_v20 = vunpack.c.l.bf16 %v261_v19  ;;  %v275_v28 = vmul.f32 %v273_v25, %v239_v50  ;;  %v437_v25 = vpack.i.b16 %v2000_v18, %v2000_v18 }
 0x156   :  { %v270_v22 = vadd.f32 %v268_v20, %v266_v14  ;;  %v439_v33 = vperm.slane %v437_v25, 0  ;;  %v2335_v25 = vld [vmem:[#allocation2 + $0xe8] sm:$0xff] }
 0x158   :  { %v272_v23 = vpack.c.bf16 %v270_v22, %v270_v22 }
 0x15a   :  { %v274_v27 = vunpack.c.l.bf16 %v272_v23 }
 0x15c   :  { %v276_v29 = vmul.f32 %v274_v27, %v240_v62  ;;  %v2328_v62 = vld [vmem:[#allocation2 + $0xb0] sm:$0xff] }
 0x15d   :  { %553 = vmatpush.bf16.msra.mxu3 %v2328_v62 }
 0x15e   :  { %v277_v30 = vpack.c.bf16 %v276_v29, %v275_v28  ;;  %v2323_v29 = vld [vmem:[#allocation2 + $0x88] sm:$0xff] }
 0x160   :  { %351 = vmatmul.bf16.vlgmr.msra.gmra.mxu2 %v277_v30  ;;  %v425_v30 = vunpack.c.l.bf16 %v2620_v24  ;;  %v1999_v24 = vld [vmem:[%s2985_s28 + $0x1] sm:$0x1] }
 0x161   :  { %554 = vmatpush.bf16.msra.mxu3 %v2327_v5  ;;  %v454_v49 = vpack.i.b16 %v1999_v24, %v1999_v24 }
 0x165   :  { %555 = vmatpush.bf16.msra.mxu3 %v2326_v9 }
 0x169   :  { %556 = vmatpush.bf16.msra.mxu3 %v2325_v15 }
 0x16d   :  { %557 = vmatpush.bf16.msra.mxu3 %v2324_v21  ;;  %v2033_v21 = vld [vmem:[%s2983_s26 + $0x2] sm:$0x1] }
 0x171   :  { %558 = vmatpush.bf16.msra.mxu3 %v2323_v29 }
 0x175   :  { %559 = vmatpush.bf16.msra.mxu3 %v2322_v35 }
 0x1e3   :  { %v352_v36 = vpop.f32.mrf.mxu2 }
 0x1e4   :  { %v357_v37 = vpack.c.bf16 %v352_v36, %v352_v36 }
 0x1e6   :  { %v365_v39 = vunpack.c.l.bf16 %v357_v37 }
 0x1e8   :  { %v368_v41 = vadd.f32 %v367_v38, %v365_v39  ;;  %v440_v39 = vunpack.c.l.bf16 %v439_v33 }
 0x1ea   :  { %v370_v42 = vpack.c.bf16 %v368_v41, %v368_v41 }
 0x1eb   :  { %v354_v44 = vpop.f32.mrf.mxu2 }
 0x1ec   :  { %v383_v45 = vunpack.c.l.bf16 %v370_v42  ;;  %v358_v46 = vpack.c.bf16 %v354_v44, %v354_v44  ;;  %v426_v42 = vunpack.c.l.bf16 %v2622_v26 }
 0x1ee   :  { %v385_v47 = vmul.f32 %v383_v45, %v382_v43  ;;  %v366_v48 = vunpack.c.l.bf16 %v358_v46 }
 0x1f0   :  { %v387_v50 = vpack.c.bf16 %v385_v47, %v385_v47  ;;  %v369_v51 = vadd.f32 %v367_v38, %v366_v48 }
 0x1f2   :  { %v389_v52 = vunpack.c.l.bf16 %v387_v50  ;;  %v371_v53 = vpack.c.bf16 %v369_v51, %v369_v51  ;;  %v431_v51 = vld [vmem:[%s2985_s28] sm:$0x1] }
 0x1f3   :  { %v465_v54 = vpack.i.b16 %v431_v51, %v431_v51 }
 0x1f4   :  { %2401 = vtanh.f32 %v389_v52  ;;  %v384_v55 = vunpack.c.l.bf16 %v371_v53  ;;  %v456_v53 = vperm.slane %v454_v49, 0  ;;  %v2330_v49 = vld [vmem:[#allocation2 + $0xc0] sm:$0xff] }
 0x1f6   :  { %v386_v57 = vmul.f32 %v384_v55, %v382_v43  ;;  %v457_v58 = vunpack.c.l.bf16 %v456_v53 }
 0x1f8   :  { %v388_v60 = vpack.c.bf16 %v386_v57, %v386_v57 }
 0x1fa   :  { %v2402_v63 = vpop.eup %2401  ;;  %v390_v0 = vunpack.c.l.bf16 %v388_v60  ;;  %v467_v60 = vperm.slane %v465_v54, 0 }
 0x1fb   :  { %v393_v1 = vpack.c.bf16 %v2402_v63, %v2402_v63 }
 0x1fc   :  { %2403 = vtanh.f32 %v390_v0  ;;  %v468_v63 = vunpack.c.l.bf16 %v467_v60 }
 0x1fd   :  { %v400_v3 = vunpack.c.l.bf16 %v393_v1 }
 0x1ff   :  { %v402_v6 = vmul.f32 %v400_v3, %v399_v2 }
 0x201   :  { %v404_v7 = vpack.c.bf16 %v402_v6, %v402_v6 }
 0x202   :  { %v2404_v10 = vpop.eup %2403 }
 0x203   :  { %v411_v11 = vunpack.c.l.bf16 %v404_v7  ;;  %v394_v12 = vpack.c.bf16 %v2404_v10, %v2404_v10 }
 0x205   :  { %v413_v13 = vadd.f32 %v411_v11, %v410_v8  ;;  %v401_v14 = vunpack.c.l.bf16 %v394_v12 }
 0x207   :  { %v415_v16 = vpack.c.bf16 %v413_v13, %v413_v13  ;;  %v403_v17 = vmul.f32 %v401_v14, %v399_v2 }
 0x209   :  { %v417_v19 = vunpack.c.l.bf16 %v415_v16  ;;  %v405_v20 = vpack.c.bf16 %v403_v17, %v403_v17 }
 0x20b   :  { %v419_v22 = vmul.f32 %v417_v19, %v383_v45  ;;  %v412_v23 = vunpack.c.l.bf16 %v405_v20  ;;  %v2337_v20 = vld [vmem:[#allocation2 + $0xf8] sm:$0xff] }
 0x20c   :  { %696 = vmatpush.bf16.msrb.mxu0 %v2337_v20 }
 0x20d   :  { %v421_v27 = vpack.c.bf16 %v419_v22, %v419_v22  ;;  %v414_v28 = vadd.f32 %v412_v23, %v410_v8  ;;  %v2336_v22 = vld [vmem:[#allocation2 + $0xf0] sm:$0xff]  ;;  %v571_v23 = vpack.i.b16 %v2033_v21, %v2033_v21  ;;  %v2069_v21 = vld [vmem:[%s2983_s26 + $0x3] sm:$0x1] }
 0x20f   :  { %v423_v31 = vunpack.c.l.bf16 %v421_v27  ;;  %v416_v32 = vpack.c.bf16 %v414_v28, %v414_v28  ;;  %v2036_v27 = vld [vmem:[%s2984_s27 + $0x8] sm:$0x1]  ;;  %v573_v28 = vperm.slane %v571_v23, 0  ;;  %v2072_v23 = vld [vmem:[%s2984_s27 + $0xb] sm:$0x1] }
 0x210   :  { %697 = vmatpush.bf16.msrb.mxu0 %v2336_v22  ;;  %v588_v29 = vpack.i.b16 %v2036_v27, %v2036_v27  ;;  %v715_v22 = vpack.i.b16 %v2069_v21, %v2069_v21  ;;  %v732_v27 = vpack.i.b16 %v2072_v23, %v2072_v23  ;;  %v2341_v23 = vld [vmem:[#allocation2 + $0x118] sm:$0xff] }
 0x211   :  { %v418_v34 = vunpack.c.l.bf16 %v416_v32  ;;  %v427_v36 = vadd.f32 %v425_v30, %v423_v31  ;;  %v2334_v30 = vld [vmem:[#allocation2 + $0xe0] sm:$0xff]  ;;  %v576_v33 = vunpack.c.l.bf16 %v573_v28 }
 0x212   :  { %v590_v35 = vperm.slane %v588_v29, 0 }
 0x213   :  { %v420_v37 = vmul.f32 %v418_v34, %v384_v55  ;;  %v429_v38 = vpack.c.bf16 %v427_v36, %v427_v36  ;;  %v2333_v36 = vld [vmem:[#allocation2 + $0xd8] sm:$0xff] }
 0x214   :  { %698 = vmatpush.bf16.msrb.mxu0 %v2335_v25  ;;  %v717_v25 = vperm.slane %v715_v22, 0 }
 0x215   :  { %v422_v40 = vpack.c.bf16 %v420_v37, %v420_v37  ;;  %v441_v41 = vunpack.c.l.bf16 %v429_v38  ;;  %v2332_v38 = vld [vmem:[#allocation2 + $0xd0] sm:$0xff] }
 0x217   :  { %v424_v43 = vunpack.c.l.bf16 %v422_v40  ;;  %v443_v44 = vmul.f32 %v441_v41, %v440_v39  ;;  %v591_v40 = vunpack.c.l.bf16 %v590_v35 }
 0x218   :  { %699 = vmatpush.bf16.msrb.mxu0 %v2334_v30  ;;  %v720_v30 = vunpack.c.l.bf16 %v717_v25 }
 0x219   :  { %v428_v45 = vadd.f32 %v426_v42, %v424_v43  ;;  %v445_v46 = vpack.c.bf16 %v443_v44, %v443_v44  ;;  %v2331_v44 = vld [vmem:[#allocation2 + $0xc8] sm:$0xff] }
 0x21b   :  { %v430_v47 = vpack.c.bf16 %v428_v45, %v428_v45  ;;  %v447_v48 = vunpack.c.l.bf16 %v445_v46  ;;  %v2035_v46 = vld [vmem:[%s2984_s27 + $0x7] sm:$0x1] }
 0x21c   :  { %700 = vmatpush.bf16.msrb.mxu0 %v2333_v36 }
 0x21d   :  { %v442_v50 = vunpack.c.l.bf16 %v430_v47  ;;  %2405 = vtanh.f32 %v447_v48 }
 0x21f   :  { %v444_v52 = vmul.f32 %v442_v50, %v440_v39 }
 0x220   :  { %701 = vmatpush.bf16.msrb.mxu0 %v2332_v38 }
 0x221   :  { %v446_v26 = vpack.c.bf16 %v444_v52, %v444_v52  ;;  %v605_v52 = vpack.i.b16 %v2035_v46, %v2035_v46 }
 0x223   :  { %v2406_v55 = vpop.eup %2405  ;;  %v448_v56 = vunpack.c.l.bf16 %v446_v26  ;;  %v607_v54 = vperm.slane %v605_v52, 0 }
 0x224   :  { %v451_v57 = vpack.c.bf16 %v2406_v55, %v2406_v55  ;;  %702 = vmatpush.bf16.msrb.mxu0 %v2331_v44 }
 0x225   :  { %2407 = vtanh.f32 %v448_v56  ;;  %v2034_v56 = vld [vmem:[%s2984_s27 + $0x6] sm:$0x1]  ;;  %v608_v60 = vunpack.c.l.bf16 %v607_v54 }
 0x226   :  { %v458_v59 = vunpack.c.l.bf16 %v451_v57 }
 0x228   :  { %v460_v61 = vmul.f32 %v458_v59, %v457_v58  ;;  %703 = vmatpush.bf16.msrb.mxu0 %v2330_v49 }
 0x22a   :  { %v462_v62 = vpack.c.bf16 %v460_v61, %v460_v61  ;;  %v616_v61 = vpack.i.b16 %v2034_v56, %v2034_v56 }
 0x22b   :  { %v2408_v0 = vpop.eup %2407 }
 0x22c   :  { %v452_v1 = vpack.c.bf16 %v2408_v0, %v2408_v0  ;;  %v469_v2 = vunpack.c.l.bf16 %v462_v62  ;;  %v618_v0 = vperm.slane %v616_v61, 0 }
 0x22e   :  { %v459_v3 = vunpack.c.l.bf16 %v452_v1  ;;  %v471_v4 = vadd.f32 %v469_v2, %v468_v63 }
 0x230   :  { %v461_v5 = vmul.f32 %v459_v3, %v457_v58  ;;  %v473_v6 = vpack.c.bf16 %v471_v4, %v471_v4  ;;  %v619_v4 = vunpack.c.l.bf16 %v618_v0 }
 0x232   :  { %v463_v7 = vpack.c.bf16 %v461_v5, %v461_v5  ;;  %v475_v9 = vunpack.c.l.bf16 %v473_v6 }
 0x234   :  { %v470_v8 = vunpack.c.l.bf16 %v463_v7  ;;  %v477_v12 = vmul.f32 %v475_v9, %v441_v41 }
 0x236   :  { %v472_v10 = vadd.f32 %v470_v8, %v468_v63  ;;  %v2661_v15 = vpack.c.bf16 %v477_v12, %v477_v12 }
 0x238   :  { %v474_v11 = vpack.c.bf16 %v472_v10, %v472_v10  ;;  %v500_v17 = vunpack.c.l.b16 %v2661_v15 }
 0x23a   :  { %v476_v13 = vunpack.c.l.bf16 %v474_v11 }
 0x23c   :  { %v478_v14 = vmul.f32 %v476_v13, %v442_v50 }
 0x23e   :  { %v2663_v16 = vpack.c.bf16 %v478_v14, %v478_v14 }
 0x240   :  { %v501_v18 = vunpack.c.l.b16 %v2663_v16 }
 0x242   :  { %v502_v19 = vpack.c.b16 %v501_v18, %v500_v17 }
 0x244   :  { %560 = vmatmul.bf16.vlgmr.msra.gmra.mxu3 %v502_v19 }
 0x2c7   :  { %v561_v31 = vpop.f32.mrf.mxu3 }
 0x2c8   :  { %v566_v32 = vpack.c.bf16 %v561_v31, %v561_v31 }
 0x2ca   :  { %v574_v34 = vunpack.c.l.bf16 %v566_v32  ;;  %v734_v32 = vperm.slane %v732_v27, 0 }
 0x2cc   :  { %v577_v37 = vadd.f32 %v576_v33, %v574_v34  ;;  %v735_v35 = vunpack.c.l.bf16 %v734_v32  ;;  %v779_v32 = vunpack.c.l.bf16 %v2663_v16  ;;  %v2073_v16 = vld [vmem:[%s2985_s28 + $0x3] sm:$0x1] }
 0x2ce   :  { %v579_v39 = vpack.c.bf16 %v577_v37, %v577_v37 }
 0x2cf   :  { %v563_v41 = vpop.f32.mrf.mxu3 }
 0x2d0   :  { %v592_v42 = vunpack.c.l.bf16 %v579_v39  ;;  %v567_v43 = vpack.c.bf16 %v563_v41, %v563_v41  ;;  %v2071_v41 = vld [vmem:[%s2984_s27 + $0xa] sm:$0x1] }
 0x2d2   :  { %v594_v45 = vmul.f32 %v592_v42, %v591_v40  ;;  %v575_v24 = vunpack.c.l.bf16 %v567_v43 }
 0x2d4   :  { %v596_v47 = vpack.c.bf16 %v594_v45, %v594_v45  ;;  %v578_v48 = vadd.f32 %v576_v33, %v575_v24  ;;  %v749_v24 = vpack.i.b16 %v2071_v41, %v2071_v41 }
 0x2d6   :  { %v598_v50 = vunpack.c.l.bf16 %v596_v47  ;;  %v580_v51 = vpack.c.bf16 %v578_v48, %v578_v48  ;;  %v2070_v47 = vld [vmem:[%s2984_s27 + $0x9] sm:$0x1]  ;;  %v751_v49 = vperm.slane %v749_v24, 0  ;;  %v819_v24 = vpack.i.b16 %v2073_v16, %v2073_v16 }
 0x2d8   :  { %2409 = vtanh.f32 %v598_v50  ;;  %v593_v53 = vunpack.c.l.bf16 %v580_v51  ;;  %v760_v51 = vpack.i.b16 %v2070_v47, %v2070_v47  ;;  %v752_v54 = vunpack.c.l.bf16 %v751_v49 }
 0x2da   :  { %v595_v26 = vmul.f32 %v593_v53, %v591_v40  ;;  %v762_v56 = vperm.slane %v760_v51, 0  ;;  %v821_v51 = vperm.slane %v819_v24, 0 }
 0x2dc   :  { %v597_v55 = vpack.c.bf16 %v595_v26, %v595_v26 }
 0x2de   :  { %v2410_v57 = vpop.eup %2409  ;;  %v599_v58 = vunpack.c.l.bf16 %v597_v55 }
 0x2df   :  { %v602_v59 = vpack.c.bf16 %v2410_v57, %v2410_v57 }
 0x2e0   :  { %2411 = vtanh.f32 %v599_v58 }
 0x2e1   :  { %v609_v62 = vunpack.c.l.bf16 %v602_v59  ;;  %v763_v59 = vunpack.c.l.bf16 %v762_v56 }
 0x2e3   :  { %v611_v63 = vmul.f32 %v609_v62, %v608_v60 }
 0x2e5   :  { %v613_v1 = vpack.c.bf16 %v611_v63, %v611_v63  ;;  %v2345_v63 = vld [vmem:[#allocation2 + $0x138] sm:$0xff] }
 0x2e6   :  { %v2412_v2 = vpop.eup %2411  ;;  %906 = vmatpush.bf16.msrb.mxu1 %v2345_v63 }
 0x2e7   :  { %v603_v3 = vpack.c.bf16 %v2412_v2, %v2412_v2  ;;  %v620_v5 = vunpack.c.l.bf16 %v613_v1 }
 0x2e9   :  { %v610_v6 = vunpack.c.l.bf16 %v603_v3  ;;  %v622_v8 = vadd.f32 %v620_v5, %v619_v4  ;;  %v2075_v5 = vld [vmem:[%s2985_s28 + $0x5] sm:$0x1] }
 0x2eb   :  { %v612_v7 = vmul.f32 %v610_v6, %v608_v60  ;;  %v624_v11 = vpack.c.bf16 %v622_v8, %v622_v8 }
 0x2ed   :  { %v614_v9 = vpack.c.bf16 %v612_v7, %v612_v7  ;;  %v626_v14 = vunpack.c.l.bf16 %v624_v11  ;;  %v2343_v11 = vld [vmem:[#allocation2 + $0x128] sm:$0xff] }
 0x2ef   :  { %v621_v10 = vunpack.c.l.bf16 %v614_v9  ;;  %v628_v18 = vmul.f32 %v626_v14, %v592_v42  ;;  %v791_v9 = vpack.i.b16 %v2075_v5, %v2075_v5  ;;  %v2342_v14 = vld [vmem:[#allocation2 + $0x120] sm:$0xff] }
 0x2f1   :  { %v623_v12 = vadd.f32 %v621_v10, %v619_v4  ;;  %v2344_v4 = vld [vmem:[#allocation2 + $0x130] sm:$0xff] }
 0x2f2   :  { %907 = vmatpush.bf16.msrb.mxu1 %v2344_v4 }
 0x2f3   :  { %v625_v13 = vpack.c.bf16 %v623_v12, %v623_v12 }
 0x2f5   :  { %v627_v17 = vunpack.c.l.bf16 %v625_v13 }
 0x2f6   :  { %908 = vmatpush.bf16.msrb.mxu1 %v2343_v11  ;;  %v2108_v11 = vld [vmem:[%s2983_s26 + $0x4] sm:$0x1] }
 0x2f7   :  { %v629_v19 = vmul.f32 %v627_v17, %v593_v53  ;;  %v778_v17 = vunpack.c.l.bf16 %v2661_v15 }
 0x2f9   :  { %v630_v20 = vpack.c.bf16 %v629_v19, %v628_v18  ;;  %v793_v19 = vperm.slane %v791_v9, 0 }
 0x2fa   :  { %909 = vmatpush.bf16.msrb.mxu1 %v2342_v14  ;;  %v2351_v14 = vld [vmem:[#allocation2 + $0x168] sm:$0xff] }
 0x2fb   :  { %704 = vmatmul.bf16.vlgmr.msrb.gmra.mxu0 %v630_v20  ;;  %v794_v27 = vunpack.c.l.bf16 %v793_v19 }
 0x2fe   :  { %910 = vmatpush.bf16.msrb.mxu1 %v2341_v23 }
 0x378   :  { %v705_v28 = vpop.f32.mrf.mxu0 }
 0x379   :  { %v710_v29 = vpack.c.bf16 %v705_v28, %v705_v28 }
 0x37b   :  { %v718_v31 = vunpack.c.l.bf16 %v710_v29 }
 0x37d   :  { %v721_v33 = vadd.f32 %v720_v30, %v718_v31  ;;  %v2340_v31 = vld [vmem:[#allocation2 + $0x110] sm:$0xff] }
 0x37e   :  { %911 = vmatpush.bf16.msrb.mxu1 %v2340_v31 }
 0x37f   :  { %v723_v34 = vpack.c.bf16 %v721_v33, %v721_v33 }
 0x380   :  { %v707_v36 = vpop.f32.mrf.mxu0 }
 0x381   :  { %v736_v37 = vunpack.c.l.bf16 %v723_v34  ;;  %v711_v38 = vpack.c.bf16 %v707_v36, %v707_v36  ;;  %v2339_v36 = vld [vmem:[#allocation2 + $0x108] sm:$0xff] }
 0x382   :  { %912 = vmatpush.bf16.msrb.mxu1 %v2339_v36 }
 0x383   :  { %v738_v39 = vmul.f32 %v736_v37, %v735_v35  ;;  %v719_v40 = vunpack.c.l.bf16 %v711_v38 }
 0x385   :  { %v740_v42 = vpack.c.bf16 %v738_v39, %v738_v39  ;;  %v722_v43 = vadd.f32 %v720_v30, %v719_v40 }
 0x387   :  { %v742_v44 = vunpack.c.l.bf16 %v740_v42  ;;  %v724_v45 = vpack.c.bf16 %v722_v43, %v722_v43  ;;  %v2338_v42 = vld [vmem:[#allocation2 + $0x100] sm:$0xff] }
 0x388   :  { %913 = vmatpush.bf16.msrb.mxu1 %v2338_v42 }
 0x389   :  { %2413 = vtanh.f32 %v742_v44  ;;  %v737_v46 = vunpack.c.l.bf16 %v724_v45 }
 0x38b   :  { %v739_v48 = vmul.f32 %v737_v46, %v735_v35 }
 0x38d   :  { %v741_v50 = vpack.c.bf16 %v739_v48, %v739_v48 }
 0x38f   :  { %v2414_v52 = vpop.eup %2413  ;;  %v743_v53 = vunpack.c.l.bf16 %v741_v50 }
 0x390   :  { %v746_v26 = vpack.c.bf16 %v2414_v52, %v2414_v52 }
 0x391   :  { %2415 = vtanh.f32 %v743_v53 }
 0x392   :  { %v753_v55 = vunpack.c.l.bf16 %v746_v26  ;;  %v822_v26 = vunpack.c.l.bf16 %v821_v51 }
 0x394   :  { %v755_v57 = vmul.f32 %v753_v55, %v752_v54 }
 0x396   :  { %v757_v58 = vpack.c.bf16 %v755_v57, %v755_v57 }
 0x397   :  { %v2416_v60 = vpop.eup %2415 }
 0x398   :  { %v764_v61 = vunpack.c.l.bf16 %v757_v58  ;;  %v747_v62 = vpack.c.bf16 %v2416_v60, %v2416_v60 }
 0x39a   :  { %v766_v0 = vadd.f32 %v764_v61, %v763_v59  ;;  %v754_v1 = vunpack.c.l.bf16 %v747_v62 }
 0x39c   :  { %v768_v2 = vpack.c.bf16 %v766_v0, %v766_v0  ;;  %v756_v3 = vmul.f32 %v754_v1, %v752_v54 }
 0x39e   :  { %v770_v6 = vunpack.c.l.bf16 %v768_v2  ;;  %v758_v7 = vpack.c.bf16 %v756_v3, %v756_v3 }
 0x3a0   :  { %v772_v8 = vmul.f32 %v770_v6, %v736_v37  ;;  %v765_v10 = vunpack.c.l.bf16 %v758_v7  ;;  %v2074_v37 = vld [vmem:[%s2985_s28 + $0x4] sm:$0x1] }
 0x3a1   :  { %v808_v40 = vpack.i.b16 %v2074_v37, %v2074_v37 }
 0x3a2   :  { %v774_v12 = vpack.c.bf16 %v772_v8, %v772_v8  ;;  %v767_v13 = vadd.f32 %v765_v10, %v763_v59  ;;  %v2353_v10 = vld [vmem:[#allocation2 + $0x178] sm:$0xff] }
 0x3a3   :  { %v810_v44 = vperm.slane %v808_v40, 0  ;;  %1050 = vmatpush.bf16.msrb.mxu2 %v2353_v10 }
 0x3a4   :  { %v776_v18 = vunpack.c.l.bf16 %v774_v12  ;;  %v769_v20 = vpack.c.bf16 %v767_v13, %v767_v13  ;;  %v2352_v12 = vld [vmem:[#allocation2 + $0x170] sm:$0xff]  ;;  %v925_v13 = vpack.i.b16 %v2108_v11, %v2108_v11  ;;  %v2144_v11 = vld [vmem:[%s2983_s26 + $0x5] sm:$0x1] }
 0x3a5   :  { %v811_v49 = vunpack.c.l.bf16 %v810_v44 }
 0x3a6   :  { %v780_v21 = vadd.f32 %v778_v17, %v776_v18  ;;  %v771_v22 = vunpack.c.l.bf16 %v769_v20  ;;  %v2111_v17 = vld [vmem:[%s2984_s27 + $0xe] sm:$0x1]  ;;  %v927_v18 = vperm.slane %v925_v13, 0  ;;  %v2147_v13 = vld [vmem:[%s2984_s27 + $0x11] sm:$0x1] }
 0x3a7   :  { %1051 = vmatpush.bf16.msrb.mxu2 %v2352_v12  ;;  %v942_v19 = vpack.i.b16 %v2111_v17, %v2111_v17  ;;  %v2350_v20 = vld [vmem:[#allocation2 + $0x160] sm:$0xff]  ;;  %v1069_v12 = vpack.i.b16 %v2144_v11, %v2144_v11  ;;  %v1086_v17 = vpack.i.b16 %v2147_v13, %v2147_v13 }
 0x3a8   :  { %v782_v25 = vpack.c.bf16 %v780_v21, %v780_v21  ;;  %v773_v28 = vmul.f32 %v771_v22, %v737_v46  ;;  %v930_v23 = vunpack.c.l.bf16 %v927_v18 }
 0x3aa   :  { %v795_v29 = vunpack.c.l.bf16 %v782_v25  ;;  %v775_v30 = vpack.c.bf16 %v773_v28, %v773_v28  ;;  %v2349_v28 = vld [vmem:[#allocation2 + $0x158] sm:$0xff] }
 0x3ab   :  { %1052 = vmatpush.bf16.msrb.mxu2 %v2351_v14  ;;  %v1071_v14 = vperm.slane %v1069_v12, 0 }
 0x3ac   :  { %v797_v33 = vmul.f32 %v795_v29, %v794_v27  ;;  %v777_v34 = vunpack.c.l.bf16 %v775_v30  ;;  %v2348_v30 = vld [vmem:[#allocation2 + $0x150] sm:$0xff] }
 0x3ae   :  { %v799_v35 = vpack.c.bf16 %v797_v33, %v797_v33  ;;  %v781_v15 = vadd.f32 %v779_v32, %v777_v34 }
 0x3af   :  { %1053 = vmatpush.bf16.msrb.mxu2 %v2350_v20  ;;  %v1074_v20 = vunpack.c.l.bf16 %v1071_v14 }
 0x3b0   :  { %v801_v38 = vunpack.c.l.bf16 %v799_v35  ;;  %v783_v39 = vpack.c.bf16 %v781_v15, %v781_v15  ;;  %v2347_v15 = vld [vmem:[#allocation2 + $0x148] sm:$0xff] }
 0x3b2   :  { %2417 = vtanh.f32 %v801_v38  ;;  %v796_v41 = vunpack.c.l.bf16 %v783_v39  ;;  %v2110_v38 = vld [vmem:[%s2984_s27 + $0xd] sm:$0x1] }
 0x3b3   :  { %1054 = vmatpush.bf16.msrb.mxu2 %v2349_v28  ;;  %v959_v16 = vpack.i.b16 %v2110_v38, %v2110_v38 }
 0x3b4   :  { %v798_v43 = vmul.f32 %v796_v41, %v794_v27  ;;  %v944_v27 = vperm.slane %v942_v19, 0 }
 0x3b5   :  { %v961_v24 = vperm.slane %v959_v16, 0 }
 0x3b6   :  { %v800_v45 = vpack.c.bf16 %v798_v43, %v798_v43  ;;  %v945_v32 = vunpack.c.l.bf16 %v944_v27 }
 0x3b7   :  { %1055 = vmatpush.bf16.msrb.mxu2 %v2348_v30  ;;  %v962_v51 = vunpack.c.l.bf16 %v961_v24 }
 0x3b8   :  { %v2418_v46 = vpop.eup %2417  ;;  %v802_v47 = vunpack.c.l.bf16 %v800_v45 }
 0x3b9   :  { %v805_v48 = vpack.c.bf16 %v2418_v46, %v2418_v46 }
 0x3ba   :  { %2419 = vtanh.f32 %v802_v47  ;;  %v2109_v47 = vld [vmem:[%s2984_s27 + $0xc] sm:$0x1] }
 0x3bb   :  { %v812_v50 = vunpack.c.l.bf16 %v805_v48  ;;  %1056 = vmatpush.bf16.msrb.mxu2 %v2347_v15 }
 0x3bd   :  { %v814_v52 = vmul.f32 %v812_v50, %v811_v49 }
 0x3bf   :  { %v816_v53 = vpack.c.bf16 %v814_v52, %v814_v52  ;;  %v970_v52 = vpack.i.b16 %v2109_v47, %v2109_v47 }
 0x3c0   :  { %v2420_v54 = vpop.eup %2419 }
 0x3c1   :  { %v806_v55 = vpack.c.bf16 %v2420_v54, %v2420_v54  ;;  %v823_v56 = vunpack.c.l.bf16 %v816_v53  ;;  %v972_v54 = vperm.slane %v970_v52, 0 }
 0x3c3   :  { %v813_v57 = vunpack.c.l.bf16 %v806_v55  ;;  %v825_v58 = vadd.f32 %v823_v56, %v822_v26 }
 0x3c5   :  { %v815_v59 = vmul.f32 %v813_v57, %v811_v49  ;;  %v827_v60 = vpack.c.bf16 %v825_v58, %v825_v58  ;;  %v973_v58 = vunpack.c.l.bf16 %v972_v54 }
 0x3c7   :  { %v817_v61 = vpack.c.bf16 %v815_v59, %v815_v59  ;;  %v829_v63 = vunpack.c.l.bf16 %v827_v60 }
 0x3c9   :  { %v824_v62 = vunpack.c.l.bf16 %v817_v61  ;;  %v831_v2 = vmul.f32 %v829_v63, %v795_v29 }
 0x3cb   :  { %v826_v0 = vadd.f32 %v824_v62, %v822_v26  ;;  %v2702_v5 = vpack.c.bf16 %v831_v2, %v831_v2 }
 0x3cd   :  { %v828_v1 = vpack.c.bf16 %v826_v0, %v826_v0  ;;  %v854_v7 = vunpack.c.l.b16 %v2702_v5 }
 0x3cf   :  { %v830_v3 = vunpack.c.l.bf16 %v828_v1 }
 0x3d1   :  { %v832_v4 = vmul.f32 %v830_v3, %v796_v41  ;;  %v2346_v41 = vld [vmem:[#allocation2 + $0x140] sm:$0xff] }
 0x3d2   :  { %1057 = vmatpush.bf16.msrb.mxu2 %v2346_v41 }
 0x3d3   :  { %v2704_v6 = vpack.c.bf16 %v832_v4, %v832_v4 }
 0x3d5   :  { %v855_v8 = vunpack.c.l.b16 %v2704_v6 }
 0x3d7   :  { %v856_v9 = vpack.c.b16 %v855_v8, %v854_v7 }
 0x3d9   :  { %914 = vmatmul.bf16.vlgmr.msrb.gmra.mxu1 %v856_v9 }
 0x456   :  { %v915_v21 = vpop.f32.mrf.mxu1 }
 0x457   :  { %v920_v22 = vpack.c.bf16 %v915_v21, %v915_v21 }
 0x459   :  { %v928_v25 = vunpack.c.l.bf16 %v920_v22  ;;  %v1088_v22 = vperm.slane %v1086_v17, 0  ;;  %v2354_v17 = vld [vmem:[%s2986_s5] sm:$0xff] }
 0x45b   :  { %v931_v29 = vadd.f32 %v930_v23, %v928_v25  ;;  %v1089_v27 = vunpack.c.l.bf16 %v1088_v22 }
 0x45d   :  { %v933_v31 = vpack.c.bf16 %v931_v29, %v931_v29 }
 0x45e   :  { %v917_v33 = vpop.f32.mrf.mxu1 }
 0x45f   :  { %v946_v34 = vunpack.c.l.bf16 %v933_v31  ;;  %v921_v35 = vpack.c.bf16 %v917_v33, %v917_v33  ;;  %v2146_v33 = vld [vmem:[%s2984_s27 + $0x10] sm:$0x1] }
 0x461   :  { %v948_v36 = vmul.f32 %v946_v34, %v945_v32  ;;  %v929_v37 = vunpack.c.l.bf16 %v921_v35 }
 0x463   :  { %v950_v39 = vpack.c.bf16 %v948_v36, %v948_v36  ;;  %v932_v40 = vadd.f32 %v930_v23, %v929_v37  ;;  %v1103_v37 = vpack.i.b16 %v2146_v33, %v2146_v33 }
 0x465   :  { %v952_v42 = vunpack.c.l.bf16 %v950_v39  ;;  %v934_v43 = vpack.c.bf16 %v932_v40, %v932_v40  ;;  %v2145_v39 = vld [vmem:[%s2984_s27 + $0xf] sm:$0x1]  ;;  %v1105_v41 = vperm.slane %v1103_v37, 0 }
 0x466   :  { %v1114_v16 = vpack.i.b16 %v2145_v39, %v2145_v39 }
 0x467   :  { %2421 = vtanh.f32 %v952_v42  ;;  %v947_v44 = vunpack.c.l.bf16 %v934_v43  ;;  %v2361_v42 = vld [vmem:[%s2986_s5 + $0x38] sm:$0xff]  ;;  %v1106_v47 = vunpack.c.l.bf16 %v1105_v41 }
 0x468   :  { %1252 = vmatpush.bf16.msrb.mxu3 %v2361_v42 }
 0x469   :  { %v949_v45 = vmul.f32 %v947_v44, %v945_v32 }
 0x46b   :  { %v951_v46 = vpack.c.bf16 %v949_v45, %v949_v45 }
 0x46d   :  { %v2422_v48 = vpop.eup %2421  ;;  %v953_v49 = vunpack.c.l.bf16 %v951_v46 }
 0x46e   :  { %v956_v50 = vpack.c.bf16 %v2422_v48, %v2422_v48 }
 0x46f   :  { %2423 = vtanh.f32 %v953_v49  ;;  %v1116_v49 = vperm.slane %v1114_v16, 0 }
 0x470   :  { %v963_v53 = vunpack.c.l.bf16 %v956_v50  ;;  %v2359_v50 = vld [vmem:[%s2986_s5 + $0x28] sm:$0xff] }
 0x472   :  { %v965_v26 = vmul.f32 %v963_v53, %v962_v51  ;;  %v1117_v53 = vunpack.c.l.bf16 %v1116_v49 }
 0x474   :  { %v967_v55 = vpack.c.bf16 %v965_v26, %v965_v26  ;;  %v2358_v26 = vld [vmem:[%s2986_s5 + $0x20] sm:$0xff] }
 0x475   :  { %v2424_v56 = vpop.eup %2423 }
 0x476   :  { %v957_v57 = vpack.c.bf16 %v2424_v56, %v2424_v56  ;;  %v974_v59 = vunpack.c.l.bf16 %v967_v55 }
 0x478   :  { %v964_v60 = vunpack.c.l.bf16 %v957_v57  ;;  %v976_v62 = vadd.f32 %v974_v59, %v973_v58  ;;  %v2357_v59 = vld [vmem:[%s2986_s5 + $0x18] sm:$0xff] }
 0x47a   :  { %v966_v61 = vmul.f32 %v964_v60, %v962_v51  ;;  %v978_v1 = vpack.c.bf16 %v976_v62, %v976_v62  ;;  %v2150_v62 = vld [vmem:[%s2985_s28 + $0x8] sm:$0x1] }
 0x47c   :  { %v968_v63 = vpack.c.bf16 %v966_v61, %v966_v61  ;;  %v980_v4 = vunpack.c.l.bf16 %v978_v1  ;;  %v2356_v1 = vld [vmem:[%s2986_s5 + $0x10] sm:$0xff] }
 0x47e   :  { %v975_v0 = vunpack.c.l.bf16 %v968_v63  ;;  %v982_v8 = vmul.f32 %v980_v4, %v946_v34  ;;  %v1145_v4 = vpack.i.b16 %v2150_v62, %v2150_v62  ;;  %v2184_v62 = vld [vmem:[%s2951_s9 + $0x2] sm:$0x1] }
 0x480   :  { %v977_v2 = vadd.f32 %v975_v0, %v973_v58  ;;  %v1147_v13 = vperm.slane %v1145_v4, 0 }
 0x482   :  { %v979_v3 = vpack.c.bf16 %v977_v2, %v977_v2 }
 0x484   :  { %v981_v7 = vunpack.c.l.bf16 %v979_v3 }
 0x486   :  { %v983_v9 = vmul.f32 %v981_v7, %v947_v44  ;;  %v2360_v44 = vld [vmem:[%s2986_s5 + $0x30] sm:$0xff] }
 0x487   :  { %1253 = vmatpush.bf16.msrb.mxu3 %v2360_v44 }
 0x488   :  { %v984_v10 = vpack.c.bf16 %v983_v9, %v982_v8  ;;  %v2355_v9 = vld [vmem:[%s2986_s5 + $0x8] sm:$0xff] }
 0x48a   :  { %1058 = vmatmul.bf16.vlgmr.msrb.gmra.mxu2 %v984_v10  ;;  %v1132_v10 = vunpack.c.l.bf16 %v2702_v5 }
 0x48b   :  { %1254 = vmatpush.bf16.msrb.mxu3 %v2359_v50 }
 0x48f   :  { %1255 = vmatpush.bf16.msrb.mxu3 %v2358_v26 }
 0x493   :  { %1256 = vmatpush.bf16.msrb.mxu3 %v2357_v59 }
 0x497   :  { %1257 = vmatpush.bf16.msrb.mxu3 %v2356_v1 }
 0x49b   :  { %1258 = vmatpush.bf16.msrb.mxu3 %v2355_v9 }
 0x49f   :  { %1259 = vmatpush.bf16.msrb.mxu3 %v2354_v17 }
 0x50d   :  { %v1059_v18 = vpop.f32.mrf.mxu2 }
 0x50e   :  { %v1064_v19 = vpack.c.bf16 %v1059_v18, %v1059_v18 }
 0x510   :  { %v1072_v21 = vunpack.c.l.bf16 %v1064_v19 }
 0x512   :  { %v1075_v23 = vadd.f32 %v1074_v20, %v1072_v21  ;;  %v1148_v21 = vunpack.c.l.bf16 %v1147_v13 }
 0x514   :  { %v1077_v25 = vpack.c.bf16 %v1075_v23, %v1075_v23 }
 0x515   :  { %v1061_v28 = vpop.f32.mrf.mxu2 }
 0x516   :  { %v1090_v29 = vunpack.c.l.bf16 %v1077_v25  ;;  %v1065_v30 = vpack.c.bf16 %v1061_v28, %v1061_v28  ;;  %v1133_v25 = vunpack.c.l.bf16 %v2704_v6 }
 0x518   :  { %v1092_v31 = vmul.f32 %v1090_v29, %v1089_v27  ;;  %v1073_v32 = vunpack.c.l.bf16 %v1065_v30 }
 0x51a   :  { %v1094_v34 = vpack.c.bf16 %v1092_v31, %v1092_v31  ;;  %v1076_v35 = vadd.f32 %v1074_v20, %v1073_v32 }
 0x51c   :  { %v1096_v15 = vunpack.c.l.bf16 %v1094_v34  ;;  %v1078_v36 = vpack.c.bf16 %v1076_v35, %v1076_v35 }
 0x51e   :  { %2425 = vtanh.f32 %v1096_v15  ;;  %v1091_v38 = vunpack.c.l.bf16 %v1078_v36  ;;  %v2148_v36 = vld [vmem:[%s2985_s28 + $0x6] sm:$0x1] }
 0x51f   :  { %v1173_v41 = vpack.i.b16 %v2148_v36, %v2148_v36 }
 0x520   :  { %v1093_v40 = vmul.f32 %v1091_v38, %v1089_v27 }
 0x521   :  { %v1175_v16 = vperm.slane %v1173_v41, 0 }
 0x522   :  { %v1095_v43 = vpack.c.bf16 %v1093_v40, %v1093_v40 }
 0x524   :  { %v2426_v45 = vpop.eup %2425  ;;  %v1097_v24 = vunpack.c.l.bf16 %v1095_v43 }
 0x525   :  { %v1100_v46 = vpack.c.bf16 %v2426_v45, %v2426_v45 }
 0x526   :  { %2427 = vtanh.f32 %v1097_v24 }
 0x527   :  { %v1107_v48 = vunpack.c.l.bf16 %v1100_v46  ;;  %v1176_v46 = vunpack.c.l.bf16 %v1175_v16 }
 0x529   :  { %v1109_v51 = vmul.f32 %v1107_v48, %v1106_v47 }
 0x52b   :  { %v1111_v52 = vpack.c.bf16 %v1109_v51, %v1109_v51 }
 0x52c   :  { %v2428_v54 = vpop.eup %2427 }
 0x52d   :  { %v1118_v55 = vunpack.c.l.bf16 %v1111_v52  ;;  %v1101_v56 = vpack.c.bf16 %v2428_v54, %v2428_v54 }
 0x52f   :  { %v1120_v57 = vadd.f32 %v1118_v55, %v1117_v53  ;;  %v1108_v58 = vunpack.c.l.bf16 %v1101_v56 }
 0x531   :  { %v1122_v60 = vpack.c.bf16 %v1120_v57, %v1120_v57  ;;  %v1110_v61 = vmul.f32 %v1108_v58, %v1106_v47 }
 0x533   :  { %v1124_v63 = vunpack.c.l.bf16 %v1122_v60  ;;  %v1112_v0 = vpack.c.bf16 %v1110_v61, %v1110_v61  ;;  %v1268_v60 = vld [vmem:[%s2950_s8] sm:$0x1] }
 0x534   :  { %v1270_v61 = vpack.i.b16 %v1268_v60, %v1268_v60 }
 0x535   :  { %v1126_v2 = vmul.f32 %v1124_v63, %v1090_v29  ;;  %v1119_v3 = vunpack.c.l.bf16 %v1112_v0  ;;  %v2149_v29 = vld [vmem:[%s2985_s28 + $0x7] sm:$0x1]  ;;  %v1286_v0 = vpack.i.b16 %v2184_v62, %v2184_v62 }
 0x536   :  { %v1162_v33 = vpack.i.b16 %v2149_v29, %v2149_v29  ;;  %v1272_v63 = vperm.slane %v1270_v61, 0 }
 0x537   :  { %v1128_v7 = vpack.c.bf16 %v1126_v2, %v1126_v2  ;;  %v1121_v8 = vadd.f32 %v1119_v3, %v1117_v53 }
 0x538   :  { %v1164_v15 = vperm.slane %v1162_v33, 0  ;;  %v1275_v3 = vunpack.c.l.bf16 %v1272_v63 }
 0x539   :  { %v1130_v11 = vunpack.c.l.bf16 %v1128_v7  ;;  %v1123_v12 = vpack.c.bf16 %v1121_v8, %v1121_v8  ;;  %v1288_v7 = vperm.slane %v1286_v0, 0 }
 0x53a   :  { %v1165_v40 = vunpack.c.l.bf16 %v1164_v15 }
 0x53b   :  { %v1125_v14 = vunpack.c.l.bf16 %v1123_v12  ;;  %v1134_v18 = vadd.f32 %v1132_v10, %v1130_v11  ;;  %v1289_v10 = vunpack.c.l.bf16 %v1288_v7 }
 0x53d   :  { %v1127_v19 = vmul.f32 %v1125_v14, %v1091_v38  ;;  %v1136_v20 = vpack.c.bf16 %v1134_v18, %v1134_v18 }
 0x53f   :  { %v1129_v22 = vpack.c.bf16 %v1127_v19, %v1127_v19  ;;  %v1149_v23 = vunpack.c.l.bf16 %v1136_v20  ;;  %v2183_v20 = vld [vmem:[%s2951_s9 + $0x1] sm:$0x1] }
 0x541   :  { %v1131_v27 = vunpack.c.l.bf16 %v1129_v22  ;;  %v1151_v5 = vmul.f32 %v1149_v23, %v1148_v21 }
 0x543   :  { %v1135_v28 = vadd.f32 %v1133_v25, %v1131_v27  ;;  %v1153_v30 = vpack.c.bf16 %v1151_v5, %v1151_v5  ;;  %v1280_v5 = vld [vmem:[%s2951_s9] sm:$0x1] }
 0x545   :  { %v1137_v31 = vpack.c.bf16 %v1135_v28, %v1135_v28  ;;  %v1155_v32 = vunpack.c.l.bf16 %v1153_v30  ;;  %v1314_v30 = vpack.i.b16 %v1280_v5, %v1280_v5 }
 0x547   :  { %v1150_v34 = vunpack.c.l.bf16 %v1137_v31  ;;  %2429 = vtanh.f32 %v1155_v32  ;;  %v1316_v15 = vperm.slane %v1314_v30, 0  ;;  %v2201_v30 = vld [vmem:[%s2954_s12 + $0x24] sm:$0xf0] }
 0x549   :  { %v1152_v35 = vmul.f32 %v1150_v34, %v1148_v21 }
 0x54b   :  { %v1154_v6 = vpack.c.bf16 %v1152_v35, %v1152_v35 }
 0x54d   :  { %v2430_v37 = vpop.eup %2429  ;;  %v1156_v38 = vunpack.c.l.bf16 %v1154_v6 }
 0x54e   :  { %v1159_v39 = vpack.c.bf16 %v2430_v37, %v2430_v37  ;;  %v1317_v37 = vunpack.c.l.bf16 %v1316_v15 }
 0x54f   :  { %2431 = vtanh.f32 %v1156_v38 }
 0x550   :  { %v1166_v42 = vunpack.c.l.bf16 %v1159_v39 }
 0x552   :  { %v1168_v43 = vmul.f32 %v1166_v42, %v1165_v40 }
 0x554   :  { %v1170_v44 = vpack.c.bf16 %v1168_v43, %v1168_v43 }
 0x555   :  { %v2432_v45 = vpop.eup %2431 }
 0x556   :  { %v1160_v24 = vpack.c.bf16 %v2432_v45, %v2432_v45  ;;  %v1177_v47 = vunpack.c.l.bf16 %v1170_v44 }
 0x558   :  { %v1167_v48 = vunpack.c.l.bf16 %v1160_v24  ;;  %v1179_v50 = vadd.f32 %v1177_v47, %v1176_v46 }
 0x55a   :  { %v1169_v49 = vmul.f32 %v1167_v48, %v1165_v40  ;;  %v1181_v53 = vpack.c.bf16 %v1179_v50, %v1179_v50 }
 0x55c   :  { %v1171_v51 = vpack.c.bf16 %v1169_v49, %v1169_v49  ;;  %v1183_v55 = vunpack.c.l.bf16 %v1181_v53 }
 0x55e   :  { %v1178_v52 = vunpack.c.l.bf16 %v1171_v51  ;;  %v1185_v57 = vmul.f32 %v1183_v55, %v1149_v23  ;;  %v1303_v23 = vpack.i.b16 %v2183_v20, %v2183_v20 }
 0x560   :  { %v1180_v26 = vadd.f32 %v1178_v52, %v1176_v46  ;;  %v1305_v28 = vperm.slane %v1303_v23, 0  ;;  %v2195_v23 = vld [vmem:[%s2954_s12 + $0x8] sm:$0xf] }
 0x562   :  { %v1182_v54 = vpack.c.bf16 %v1180_v26, %v1180_v26 }
 0x564   :  { %v1184_v56 = vunpack.c.l.bf16 %v1182_v54 }
 0x566   :  { %v1186_v58 = vmul.f32 %v1184_v56, %v1150_v34  ;;  %v1306_v34 = vunpack.c.l.bf16 %v1305_v28  ;;  %v2484_v56 = vmov 32.0  }
 0x568   :  { %v1187_v59 = vpack.c.bf16 %v1186_v58, %v1185_v57 }
 0x56a   :  { %1260 = vmatmul.bf16.vlgmr.msrb.gmra.mxu3 %v1187_v59 }
 0x5ed   :  { %v1261_v1 = vpop.f32.mrf.mxu3 }
 0x5ee   :  { %v1266_v2 = vpack.c.bf16 %v1261_v1, %v1261_v1 }
 0x5f0   :  { %v1273_v4 = vunpack.c.l.bf16 %v1266_v2 }
 0x5f2   :  { %v1276_v8 = vadd.f32 %v1275_v3, %v1273_v4 }
 0x5f4   :  { %v1278_v9 = vpack.c.bf16 %v1276_v8, %v1276_v8 }
 0x5f5   :  { %v1263_v11 = vpop.f32.mrf.mxu3 }
 0x5f6   :  { %v1290_v12 = vunpack.c.l.bf16 %v1278_v9  ;;  %v1267_v13 = vpack.c.bf16 %v1263_v11, %v1263_v11  ;;  %v2199_v11 = vld [vmem:[%s2954_s12 + $0x18] sm:$0xf] }
 0x5f8   :  { %v1292_v14 = vmul.f32 %v1290_v12, %v1289_v10  ;;  %v1274_v17 = vunpack.c.l.bf16 %v1267_v13  ;;  %v2207_v13 = vld [vmem:[%s2954_s12 + $0x20] sm:$0xf] }
 0x5fa   :  { %v1294_v18 = vpack.c.bf16 %v1292_v14, %v1292_v14  ;;  %v1277_v19 = vadd.f32 %v1275_v3, %v1274_v17  ;;  %v2367_v17 = vld [vmem:[%s2954_s12 + $0x28] sm:$0xf0] }
 0x5fc   :  { %v1296_v21 = vunpack.c.l.bf16 %v1294_v18  ;;  %v1279_v22 = vpack.c.bf16 %v1277_v19, %v1277_v19  ;;  %v2208_v18 = vor.u32 %v2367_v17, %v2207_v13 }
 0x5fe   :  { %2433 = vtanh.f32 %v1296_v21  ;;  %v1291_v25 = vunpack.c.l.bf16 %v1279_v22  ;;  %v2187_v21 = vld [vmem:[%s2954_s12] sm:$0xf]  ;;  %v2363_v22 = vld [vmem:[%s2954_s12 + $0x8] sm:$0xf0]  ;;  %1474 = vmatpush.bf16.msra.mxu1 %v2208_v18 }
 0x600   :  { %v1293_v27 = vmul.f32 %v1291_v25, %v1289_v10 }
 0x602   :  { %v1295_v29 = vpack.c.bf16 %v1293_v27, %v1293_v27  ;;  %v2364_v27 = vld [vmem:[%s2954_s12 + $0x10] sm:$0xf0] }
 0x603   :  { %v2196_v28 = vor.u32 %v2364_v27, %v2195_v23 }
 0x604   :  { %v2434_v31 = vpop.eup %2433  ;;  %v1297_v32 = vunpack.c.l.bf16 %v1295_v29  ;;  %v2365_v29 = vld [vmem:[%s2954_s12 + $0x1c] sm:$0xf] }
 0x605   :  { %v1300_v33 = vpack.c.bf16 %v2434_v31, %v2434_v31  ;;  %1475 = vmatpush.bf16.msra.mxu1 %v2196_v28  ;;  %v2362_v31 = vld [vmem:[%s2954_s12 + $0x4] sm:$0xf] }
 0x606   :  { %2435 = vtanh.f32 %v1297_v32 }
 0x607   :  { %v1307_v35 = vunpack.c.l.bf16 %v1300_v33  ;;  %2437 = vrcp.f32 %v2484_v56  ;;  %v2204_v33 = vor.u32 %v2365_v29, %v2201_v30 }
 0x609   :  { %v1309_v36 = vmul.f32 %v1307_v35, %v1306_v34 }
 0x60b   :  { %v1311_v6 = vpack.c.bf16 %v1309_v36, %v1309_v36 }
 0x60c   :  { %v2436_v38 = vpop.eup %2435 }
 0x60d   :  { %v1301_v39 = vpack.c.bf16 %v2436_v38, %v2436_v38  ;;  %v1318_v40 = vunpack.c.l.bf16 %v1311_v6  ;;  %v2438_v57 = vpop.eup %2437 }
 0x60e   :  { %v1340_v58 = vmul.f32 32.0, %v2438_v57  ;;  %vm1344_vm3 = vweird.f32 %v2438_v57 }
 0x60f   :  { %v1308_v41 = vunpack.c.l.bf16 %v1301_v39  ;;  %v1320_v42 = vadd.f32 %v1318_v40, %v1317_v37 }
 0x610   :  { %v1341_v59 = vsub.f32 1.0, %v1340_v58  ;;  %v1486_v58 = vld [vmem:[%s2955_s13] sm:$0x7] }
 0x611   :  { %v1310_v43 = vmul.f32 %v1308_v41, %v1306_v34  ;;  %v1322_v16 = vpack.c.bf16 %v1320_v42, %v1320_v42  ;;  %v2189_v34 = vld [vmem:[%s2954_s12 + $0xc] sm:$0xf0]  ;;  %1488 = vst [vmem:[#allocation1] ss:$9 sm:$0xff] %v1486_v58 }
 0x612   :  { %v1342_v60 = vmul.f32 %v2438_v57, %v1341_v59  ;;  %v2192_v15 = vor.u32 %v2362_v31, %v2189_v34  ;;  %v2375_v59 = vld [vmem:[%s2956_s14 + $0x38] sm:$0xff] }
 0x613   :  { %v1324_v44 = vunpack.c.l.bf16 %v1322_v16  ;;  %v1312_v45 = vpack.c.bf16 %v1310_v43, %v1310_v43  ;;  %1597 = vmatpush.bf16.msra.mxu2 %v2375_v59 }
 0x614   :  { %v1343_v61 = vadd.f32 %v2438_v57, %v1342_v60  ;;  %v2374_v60 = vld [vmem:[%s2956_s14 + $0x30] sm:$0xff] }
 0x615   :  { %v1326_v24 = vmul.f32 %v1324_v44, %v1290_v12  ;;  %v1319_v46 = vunpack.c.l.bf16 %v1312_v45  ;;  %v2366_v12 = vld [vmem:[%s2954_s12 + $0x20] sm:$0xf0] }
 0x616   :  { %v1345_v62 = vsel %vm1344_vm3, %v2438_v57, %v1343_v61  ;;  %v2200_v14 = vor.u32 %v2366_v12, %v2199_v11  ;;  %v2373_v61 = vld [vmem:[%s2956_s14 + $0x28] sm:$0xff] }
 0x617   :  { %v1328_v47 = vpack.c.bf16 %v1326_v24, %v1326_v24  ;;  %v1321_v48 = vadd.f32 %v1319_v46, %v1317_v37  ;;  %v2394_v46 = vld [vmem:[%s2952_s10] ss:$0 sm:$0xff]  ;;  %1598 = vmatpush.bf16.msra.mxu2 %v2374_v60 }
 0x618   :  { %1446 = vmatpush.bf16.msra.mxu0 %v2200_v14 }
 0x619   :  { %v2779_v49 = vunpack.c.l.bf16 %v1328_v47  ;;  %v1323_v50 = vpack.c.bf16 %v1321_v48, %v1321_v48 }
 0x61b   :  { %v1333_v51 = vsel %vm1332_vm2, %v2779_v49, 0.0  ;;  %v1325_v52 = vunpack.c.l.bf16 %v1323_v50  ;;  %1599 = vmatpush.bf16.msra.mxu2 %v2373_v61 }
 0x61c   :  { %1334 = vadd.xlane.f32.xlu0 %v1333_v51  ;;  %v2395_v51 = vld [vmem:[%s2953_s11] ss:$0 sm:$0xff] }
 0x61d   :  { %v1327_v53 = vmul.f32 %v1325_v52, %v1291_v25  ;;  %v2188_v25 = vor.u32 %v2363_v22, %v2187_v21 }
 0x61f   :  { %v1329_v26 = vpack.c.bf16 %v1327_v53, %v1327_v53  ;;  %1447 = vmatpush.bf16.msra.mxu0 %v2188_v25 }
 0x621   :  { %v2783_v54 = vunpack.c.l.bf16 %v1329_v26 }
 0x623   :  { %v1336_v55 = vsel %vm1332_vm2, %v2783_v54, 0.0  ;;  %1460 = vmatpush.bf16.msrb.mxu0 %v2204_v33 }
 0x624   :  { %1337 = vadd.xlane.f32.xlu0 %v1336_v55 }
 0x627   :  { %1461 = vmatpush.bf16.msrb.mxu0 %v2192_v15 }
 0x68f   :  { %v1335_v63 = vpop.xlane.xlu0 %1334 }
 0x690   :  { %v1346_v0 = vmul.f32 %v1345_v62, %v1335_v63  ;;  %v2371_v63 = vld [vmem:[%s2956_s14 + $0x18] sm:$0xff] }
 0x692   :  { %v1348_v1 = vsub.f32 %v2779_v49, %v1346_v0  ;;  %v2370_v0 = vld [vmem:[%s2956_s14 + $0x10] sm:$0xff] }
 0x694   :  { %v1350_v2 = vmul.f32 %v1348_v1, %v1348_v1 }
 0x696   :  { %v1352_v3 = vsel %vm1332_vm2, %v1350_v2, 0.0  ;;  %v2369_v2 = vld [vmem:[%s2956_s14 + $0x8] sm:$0xff] }
 0x697   :  { %1353 = vadd.xlane.f32.xlu1 %v1352_v3  ;;  %v1338_v4 = vpop.xlane.xlu0 %1337  ;;  %v2368_v3 = vld [vmem:[%s2956_s14] sm:$0xff] }
 0x698   :  { %v1347_v7 = vmul.f32 %v1345_v62, %v1338_v4  ;;  %v1489_v4 = vld [vmem:[#allocation1] sm:$0xff] }
 0x69a   :  { %v1349_v8 = vsub.f32 %v2783_v54, %v1347_v7  ;;  %v1490_v7 = vld [vmem:[#allocation1 + $0x9] sm:$0xff] }
 0x69c   :  { %v1351_v9 = vmul.f32 %v1349_v8, %v1349_v8 }
 0x69e   :  { %v1355_v10 = vsel %vm1332_vm2, %v1351_v9, 0.0  ;;  %v1492_v9 = vpack.i.b16 %v1489_v4, %v1489_v4 }
 0x69f   :  { %1356 = vadd.xlane.f32.xlu1 %v1355_v10  ;;  %v1495_v10 = vpack.i.b16 %v1490_v7, %v1490_v7  ;;  %v1491_v7 = vld [vmem:[#allocation1 + $0x12] sm:$0xff] }
 0x6a0   :  { %v1494_v11 = vperm.slane %v1492_v9, 0 }
 0x6a1   :  { %v1497_v12 = vperm.slane %v1495_v10, 0 }
 0x6a2   :  { %v1507_v17 = vunpack.c.l.bf16 %v1494_v11 }
 0x6a3   :  { %v1508_v18 = vunpack.c.l.bf16 %v1497_v12 }
 0x70a   :  { %v1354_v19 = vpop.xlane.xlu1 %1353 }
 0x70b   :  { %v1358_v20 = vmul.f32 %v1354_v19, %v1345_v62 }
 0x70d   :  { %v1360_v5 = vadd.f32 1e-05, %v1358_v20 }
 0x70f   :  { %2439 = vrsqrt.f32 %v1360_v5  ;;  %vm1368_vm5 = vweird.f32 %v1360_v5 }
 0x712   :  { %v1357_v32 = vpop.xlane.xlu1 %1356 }
 0x713   :  { %v1359_v35 = vmul.f32 %v1357_v32, %v1345_v62  ;;  %v2372_v62 = vld [vmem:[%s2956_s14 + $0x20] sm:$0xff] }
 0x714   :  { %1600 = vmatpush.bf16.msra.mxu2 %v2372_v62 }
 0x715   :  { %v2440_v36 = vpop.eup %2439  ;;  %v1361_v6 = vadd.f32 1e-05, %v1359_v35 }
 0x716   :  { %v1363_v37 = vmul.f32 %v2440_v36, %v1360_v5  ;;  %vm1369_vm4 = vweird.f32 %v2440_v36 }
 0x717   :  { %2441 = vrsqrt.f32 %v1361_v6  ;;  %vm1370_vm6 = vmor %vm1368_vm5, %vm1369_vm4  ;;  %vm1378_vm8 = vweird.f32 %v1361_v6 }
 0x718   :  { %v1364_v38 = vmul.f32 %v2440_v36, %v1363_v37  ;;  %1601 = vmatpush.bf16.msra.mxu2 %v2371_v63 }
 0x71a   :  { %v1365_v39 = vmul.f32 0.5, %v1364_v38 }
 0x71c   :  { %v1366_v40 = vsub.f32 1.5, %v1365_v39  ;;  %1602 = vmatpush.bf16.msra.mxu2 %v2370_v0  ;;  %v2381_v0 = vld [vmem:[%s2959_s17 + $0x18] sm:$0xff] }
 0x71d   :  { %v2442_v41 = vpop.eup %2441 }
 0x71e   :  { %v1367_v42 = vmul.f32 %v2440_v36, %v1366_v40  ;;  %v1373_v43 = vmul.f32 %v2442_v41, %v1361_v6  ;;  %vm1379_vm7 = vweird.f32 %v2442_v41 }
 0x71f   :  { %vm1380_vm9 = vmor %vm1378_vm8, %vm1379_vm7 }
 0x720   :  { %v1374_v16 = vmul.f32 %v2442_v41, %v1373_v43  ;;  %v1371_v44 = vsel %vm1370_vm6, %v2440_v36, %v1367_v42  ;;  %1603 = vmatpush.bf16.msra.mxu2 %v2369_v2  ;;  %v2376_v43 = vld [vmem:[%s2957_s15] sm:$0xff]  ;;  %v2379_v2 = vld [vmem:[%s2959_s17 + $0x8] sm:$0xff] }
 0x721   :  { %v1382_v47 = vmul.f32 %v1371_v44, %v1348_v1  ;;  %1643 = vmatpush.bf16.msra.mxu3 %v2376_v43 }
 0x722   :  { %v1375_v45 = vmul.f32 0.5, %v1374_v16 }
 0x723   :  { %v1388_v52 = vmul.f32 %v2394_v46, %v1382_v47 }
 0x724   :  { %v1376_v24 = vsub.f32 1.5, %v1375_v45  ;;  %1604 = vmatpush.bf16.msra.mxu2 %v2368_v3  ;;  %v2378_v3 = vld [vmem:[%s2959_s17] sm:$0xff] }
 0x725   :  { %v1394_v55 = vadd.f32 %v2395_v51, %v1388_v52  ;;  %v2377_v52 = vld [vmem:[%s2958_s16] sm:$0xff] }
 0x726   :  { %v1377_v48 = vmul.f32 %v2442_v41, %v1376_v24 }
 0x728   :  { %v1381_v50 = vsel %vm1380_vm9, %v2442_v41, %v1377_v48 }
 0x729   :  { %v1383_v53 = vmul.f32 %v1381_v50, %v1349_v8 }
 0x72b   :  { %v1389_v26 = vmul.f32 %v2394_v46, %v1383_v53  ;;  %v2385_v53 = vld [vmem:[%s2959_s17 + $0x38] sm:$0xff] }
 0x72c   :  { %1753 = vmatpush.bf16.msrb.mxu1 %v2385_v53 }
 0x72d   :  { %v1395_v56 = vadd.f32 %v2395_v51, %v1389_v26  ;;  %v2384_v26 = vld [vmem:[%s2959_s17 + $0x30] sm:$0xff] }
 0x72f   :  { %v1396_v57 = vpack.c.bf16 %v1395_v56, %v1394_v55  ;;  %v2383_v55 = vld [vmem:[%s2959_s17 + $0x28] sm:$0xff]  ;;  %v2382_v56 = vld [vmem:[%s2959_s17 + $0x20] sm:$0xff] }
 0x730   :  { %1754 = vmatpush.bf16.msrb.mxu1 %v2384_v26 }
 0x731   :  { %2209 = vmatmul.msk.bf16.vlgmr.msra.gmra.mxu0 %vm1332_vm2, %v1396_v57  ;;  %2211 = vmatmul.msk.bf16.vlgmr.msra.gmra.mxu1 %vm1332_vm2, %v1396_v57 }
 0x732   :  { %1673 = vmatpush.bf16.msra.mxu0 %v2377_v52 }
 0x734   :  { %1755 = vmatpush.bf16.msrb.mxu1 %v2383_v55 }
 0x738   :  { %1756 = vmatpush.bf16.msrb.mxu1 %v2382_v56 }
 0x73c   :  { %1757 = vmatpush.bf16.msrb.mxu1 %v2381_v0 }
 0x741   :  { %2210 = vmatmul.msk.bf16.vlgmr.msrb.gmra.mxu0 %vm1332_vm2, %v1396_v57 }
 0x7ae   :  { %v1449_v1 = vpop.f32.mrf.mxu0  ;;  %v1477_v4 = vpop.f32.mrf.mxu1 }
 0x7af   :  { %v1483_v10 = vpack.c.bf16 %v1477_v4, %v1477_v4 }
 0x7b6   :  { %v1451_v8 = vpop.f32.mrf.mxu0  ;;  %v1479_v9 = vpop.f32.mrf.mxu1 }
 0x7b7   :  { %v1485_v12 = vpack.c.bf16 %v1479_v9, %v1479_v9 }
 0x7be   :  { %v1463_v13 = vpop.f32.mrf.mxu0 }
 0x7bf   :  { %v1482_v14 = vpack.c.bf16 %v1463_v13, %v1449_v1  ;;  %v2380_v1 = vld [vmem:[%s2959_s17 + $0x10] sm:$0xff]  ;;  %v1503_v13 = vunpack.c.l.bf16 %v1483_v10 }
 0x7c0   :  { %1758 = vmatpush.bf16.msrb.mxu1 %v2380_v1 }
 0x7c1   :  { %v1501_v19 = vunpack.c.l.bf16 %v1482_v14  ;;  %v1502_v20 = vunpack.c.h.bf16 %v1482_v14 }
 0x7c3   :  { %v1510_v21 = vadd.f32 %v1507_v17, %v1501_v19  ;;  %v1511_v22 = vadd.f32 %v1508_v18, %v1502_v20 }
 0x7c4   :  { %1759 = vmatpush.bf16.msrb.mxu1 %v2379_v2 }
 0x7c5   :  { %v1516_v25 = vpack.c.bf16 %v1511_v22, %v1510_v21 }
 0x7c6   :  { %v1465_v23 = vpop.f32.mrf.mxu0 }
 0x7c7   :  { %v1484_v27 = vpack.c.bf16 %v1465_v23, %v1451_v8  ;;  %v1524_v29 = vrot.slane %v1516_v25, 4  ;;  %v1520_v35 = vunpack.c.l.bf16 %v1516_v25  ;;  %v1498_v8 = vpack.i.b16 %v1491_v7, %v1491_v7  ;;  %v2389_v7 = vld [vmem:[%s2963_s21 + $0x8] sm:$0xff] }
 0x7c8   :  { %1760 = vmatpush.bf16.msrb.mxu1 %v2378_v3  ;;  %1913 = vmatpush.bf16.msrb.mxu0 %v2389_v7 }
 0x7c9   :  { %v1504_v5 = vunpack.c.l.bf16 %v1484_v27  ;;  %v1505_v28 = vunpack.c.h.bf16 %v1484_v27  ;;  %v1528_v33 = vunpack.c.l.bf16 %v1524_v29  ;;  %v1500_v11 = vperm.slane %v1498_v8, 0  ;;  %v1827_v8 = vld [vmem:[%s2962_s20] sm:$0x1] }
 0x7cb   :  { %v1513_v30 = vadd.f32 %v1507_v17, %v1504_v5  ;;  %v1514_v31 = vadd.f32 %v1508_v18, %v1505_v28  ;;  %v1530_v6 = vmul.f32 %v1528_v33, %v1520_v35  ;;  %v1509_v14 = vunpack.c.l.bf16 %v1500_v11  ;;  %v2386_v35 = vld [vmem:[%s2960_s18] sm:$0xff] }
 0x7cc   :  { %v1506_v17 = vunpack.c.l.bf16 %v1485_v12  ;;  %v2388_v12 = vld [vmem:[%s2963_s21] sm:$0xff] }
 0x7cd   :  { %v1518_v32 = vpack.c.bf16 %v1514_v31, %v1513_v30  ;;  %v1512_v19 = vadd.f32 %v1509_v14, %v1503_v13  ;;  %v1861_v13 = vpack.i.b16 %v1827_v8, %v1827_v8  ;;  %1914 = vmatpush.bf16.msrb.mxu0 %v2388_v12 }
 0x7ce   :  { %v1515_v20 = vadd.f32 %v1509_v14, %v1506_v17 }
 0x7cf   :  { %v1525_v34 = vrot.slane %v1518_v32, 4  ;;  %v1521_v15 = vunpack.c.l.bf16 %v1518_v32  ;;  %v1517_v22 = vpack.c.bf16 %v1512_v19, %v1512_v19 }
 0x7d0   :  { %v1519_v23 = vpack.c.bf16 %v1515_v20, %v1515_v20 }
 0x7d1   :  { %v1529_v36 = vunpack.c.l.bf16 %v1525_v34  ;;  %v1684_v28 = vunpack.c.l.bf16 %v1517_v22  ;;  %v2387_v34 = vld [vmem:[%s2960_s18 + $0x8] sm:$0xff] }
 0x7d2   :  { %v1685_v29 = vunpack.c.l.bf16 %v1519_v23  ;;  %1805 = vmatpush.bf16.msrb.mxu3 %v2387_v34 }
 0x7d3   :  { %v1531_v37 = vmul.f32 %v1529_v36, %v1521_v15 }
 0x7d5   :  { %v1532_v38 = vpack.c.bf16 %v1531_v37, %v1530_v6 }
 0x7d6   :  { %1806 = vmatpush.bf16.msrb.mxu3 %v2386_v35 }
 0x7d7   :  { %1605 = vmatmul.bf16.vlgmr.msra.gmra.mxu2 %v1532_v38 }
 0x85a   :  { %v1606_v39 = vpop.f32.mrf.mxu2 }
 0x85b   :  { %v1612_v40 = vsel %vm1611_vm10, %v1606_v39, -inf }
 0x85c   :  { %1613 = vmax.xlane.f32.xlu2 %v1612_v40 }
 0x862   :  { %v1608_v41 = vpop.f32.mrf.mxu2 }
 0x863   :  { %v1615_v42 = vsel %vm1611_vm10, %v1608_v41, -inf }
 0x864   :  { %1616 = vmax.xlane.f32.xlu2 %v1615_v42 }
 0x8cf   :  { %v1614_v16 = vpop.xlane.xlu2 %1613 }
 0x8d0   :  { %v1618_v44 = vsub.f32 %v1606_v39, %v1614_v16 }
 0x8d2   :  { %v1620_v45 = vmul.f32 1.442695, %v1618_v44 }
 0x8d4   :  { %2443 = vpow2.f32 %v1620_v45 }
 0x8d7   :  { %v1617_v24 = vpop.xlane.xlu2 %1616 }
 0x8d8   :  { %v1619_v46 = vsub.f32 %v1608_v41, %v1617_v24  ;;  %v1815_v24 = vld [vmem:[%s2961_s19] sm:$0x1] }
 0x8da   :  { %v1622_v47 = vmul.f32 1.442695, %v1619_v46  ;;  %v2444_v48 = vpop.eup %2443  ;;  %v2296_v46 = vld [vmem:[%s2962_s20 + $0x2] sm:$0x1] }
 0x8dc   :  { %2445 = vpow2.f32 %v1622_v47 }
 0x8e2   :  { %v2446_v50 = vpop.eup %2445 }
 0x8e3   :  { %v1626_v51 = vpack.c.bf16 %v2446_v50, %v2444_v48 }
 0x8e5   :  { %2248 = vmatmul.msk.bf16.vlgmr.msra.gmra.mxu3 %vm1611_vm10, %v1626_v51 }
 0x968   :  { %v1645_v57 = vpop.f32.mrf.mxu3 }
 0x969   :  { %2447 = vrcp.f32 %v1645_v57 }
 0x96f   :  { %v2448_v59 = vpop.eup %2447 }
 0x970   :  { %v1647_v58 = vpop.f32.mrf.mxu3  ;;  %v1652_v61 = vmul.f32 %v2448_v59, %v2444_v48 }
 0x971   :  { %2449 = vrcp.f32 %v1647_v58 }
 0x977   :  { %v2450_v60 = vpop.eup %2449 }
 0x978   :  { %v1653_v62 = vmul.f32 %v2450_v60, %v2446_v50 }
 0x97a   :  { %v1656_v63 = vpack.c.bf16 %v1653_v62, %v1652_v61  ;;  %v2295_v62 = vld [vmem:[%s2962_s20 + $0x1] sm:$0x1] }
 0x97b   :  { %v1850_v3 = vpack.i.b16 %v2295_v62, %v2295_v62 }
 0x97c   :  { %2253 = vmatmul.msk.bf16.vlgmr.msra.gmra.mxu0 %vm1611_vm10, %v1656_v63 }
 0x97d   :  { %v1852_v10 = vperm.slane %v1850_v3, 0 }
 0x97f   :  { %v1853_v19 = vunpack.c.l.bf16 %v1852_v10 }
 0x9f9   :  { %v1675_v18 = vpop.f32.mrf.mxu0 }
 0x9fa   :  { %v1680_v21 = vpack.c.bf16 %v1675_v18, %v1675_v18 }
 0x9fc   :  { %v1682_v27 = vunpack.c.l.bf16 %v1680_v21  ;;  %v1863_v21 = vperm.slane %v1861_v13, 0 }
 0x9fe   :  { %v1686_v31 = vmul.f32 %v1684_v28, %v1682_v27 }
 0xa01   :  { %v1677_v25 = vpop.f32.mrf.mxu0 }
 0xa02   :  { %v1681_v5 = vpack.c.bf16 %v1677_v25, %v1677_v25  ;;  %v1864_v25 = vunpack.c.l.bf16 %v1863_v21 }
 0xa04   :  { %v1683_v30 = vunpack.c.l.bf16 %v1681_v5 }
 0xa06   :  { %v1687_v32 = vmul.f32 %v1685_v29, %v1683_v30 }
 0xa08   :  { %v1688_v33 = vpack.c.bf16 %v1687_v32, %v1686_v31 }
 0xa0a   :  { %1761 = vmatmul.bf16.vlgmr.msrb.gmra.mxu1 %v1688_v33 }
 0xa87   :  { %v1762_v15 = vpop.f32.mrf.mxu1 }
 0xa88   :  { %v1767_v36 = vpack.c.bf16 %v1762_v15, %v1762_v15 }
 0xa8a   :  { %v1769_v6 = vunpack.c.l.bf16 %v1767_v36 }
 0xa8c   :  { %v1771_v38 = vadd.f32 %v1769_v6, %v2779_v49  ;;  %v1817_v49 = vpack.i.b16 %v1815_v24, %v1815_v24 }
 0xa8e   :  { %v2904_v41 = vpack.c.bf16 %v1771_v38, %v1771_v38  ;;  %v1819_v47 = vperm.slane %v1817_v49, 0 }
 0xa8f   :  { %v1764_v37 = vpop.f32.mrf.mxu1 }
 0xa90   :  { %v1768_v39 = vpack.c.bf16 %v1764_v37, %v1764_v37  ;;  %v1781_v16 = vunpack.c.l.b16 %v2904_v41  ;;  %v1822_v51 = vunpack.c.l.bf16 %v1819_v47  ;;  %v2396_v47 = vld [vmem:[%s2964_s22] ss:$0 sm:$0xff] }
 0xa92   :  { %v1770_v40 = vunpack.c.l.bf16 %v1768_v39 }
 0xa94   :  { %v1772_v42 = vadd.f32 %v1770_v40, %v2783_v54  ;;  %v1833_v54 = vpack.i.b16 %v2296_v46, %v2296_v46 }
 0xa96   :  { %v2907_v43 = vpack.c.bf16 %v1772_v42, %v1772_v42  ;;  %v1835_v53 = vperm.slane %v1833_v54, 0 }
 0xa98   :  { %v1782_v44 = vunpack.c.l.b16 %v2907_v43  ;;  %v1836_v56 = vunpack.c.l.bf16 %v1835_v53 }
 0xa9a   :  { %v1783_v45 = vpack.c.b16 %v1782_v44, %v1781_v16  ;;  %v1879_v16 = vunpack.c.l.bf16 %v2904_v41  ;;  %v1880_v44 = vunpack.c.l.bf16 %v2907_v43 }
 0xa9c   :  { %2294 = vmatmul.msk.bf16.vlgmr.msrb.gmra.mxu3 %vm1332_vm2, %v1783_v45 }
 0xb1f   :  { %v1808_v48 = vpop.f32.mrf.mxu3 }
 0xb20   :  { %v1813_v50 = vpack.c.bf16 %v1808_v48, %v1808_v48 }
 0xb22   :  { %v1820_v52 = vunpack.c.l.bf16 %v1813_v50 }
 0xb24   :  { %v1823_v26 = vadd.f32 %v1822_v51, %v1820_v52 }
 0xb26   :  { %v1825_v55 = vpack.c.bf16 %v1823_v26, %v1823_v26 }
 0xb27   :  { %v1810_v57 = vpop.f32.mrf.mxu3 }
 0xb28   :  { %v1837_v58 = vunpack.c.l.bf16 %v1825_v55  ;;  %v1814_v59 = vpack.c.bf16 %v1810_v57, %v1810_v57 }
 0xb2a   :  { %v1839_v60 = vmul.f32 %v1837_v58, %v1836_v56  ;;  %v1821_v61 = vunpack.c.l.bf16 %v1814_v59 }
 0xb2c   :  { %v1841_v63 = vpack.c.bf16 %v1839_v60, %v1839_v60  ;;  %v1824_v0 = vadd.f32 %v1822_v51, %v1821_v61 }
 0xb2e   :  { %v1843_v1 = vunpack.c.l.bf16 %v1841_v63  ;;  %v1826_v2 = vpack.c.bf16 %v1824_v0, %v1824_v0 }
 0xb30   :  { %2451 = vtanh.f32 %v1843_v1  ;;  %v1838_v4 = vunpack.c.l.bf16 %v1826_v2 }
 0xb32   :  { %v1840_v9 = vmul.f32 %v1838_v4, %v1836_v56 }
 0xb34   :  { %v1842_v11 = vpack.c.bf16 %v1840_v9, %v1840_v9 }
 0xb36   :  { %v2452_v14 = vpop.eup %2451  ;;  %v1844_v17 = vunpack.c.l.bf16 %v1842_v11 }
 0xb37   :  { %v1847_v18 = vpack.c.bf16 %v2452_v14, %v2452_v14 }
 0xb38   :  { %2453 = vtanh.f32 %v1844_v17 }
 0xb39   :  { %v1854_v20 = vunpack.c.l.bf16 %v1847_v18 }
 0xb3b   :  { %v1856_v22 = vmul.f32 %v1854_v20, %v1853_v19 }
 0xb3d   :  { %v1858_v23 = vpack.c.bf16 %v1856_v22, %v1856_v22 }
 0xb3e   :  { %v2454_v27 = vpop.eup %2453 }
 0xb3f   :  { %v1865_v5 = vunpack.c.l.bf16 %v1858_v23  ;;  %v1848_v28 = vpack.c.bf16 %v2454_v27, %v2454_v27 }
 0xb41   :  { %v1867_v29 = vadd.f32 %v1865_v5, %v1864_v25  ;;  %v1855_v30 = vunpack.c.l.bf16 %v1848_v28 }
 0xb43   :  { %v1869_v31 = vpack.c.bf16 %v1867_v29, %v1867_v29  ;;  %v1857_v32 = vmul.f32 %v1855_v30, %v1853_v19 }
 0xb45   :  { %v1871_v33 = vunpack.c.l.bf16 %v1869_v31  ;;  %v1859_v34 = vpack.c.bf16 %v1857_v32, %v1857_v32 }
 0xb47   :  { %v1866_v35 = vunpack.c.l.bf16 %v1859_v34  ;;  %v1873_v15 = vmul.f32 %v1871_v33, %v1837_v58 }
 0xb49   :  { %v1868_v36 = vadd.f32 %v1866_v35, %v1864_v25  ;;  %v1875_v37 = vpack.c.bf16 %v1873_v15, %v1873_v15 }
 0xb4b   :  { %v1870_v6 = vpack.c.bf16 %v1868_v36, %v1868_v36  ;;  %v1877_v40 = vunpack.c.l.bf16 %v1875_v37 }
 0xb4d   :  { %v1872_v38 = vunpack.c.l.bf16 %v1870_v6  ;;  %v1881_v24 = vadd.f32 %v1879_v16, %v1877_v40 }
 0xb4f   :  { %v1874_v39 = vmul.f32 %v1872_v38, %v1838_v4 }
 0xb51   :  { %v1876_v42 = vpack.c.bf16 %v1874_v39, %v1874_v39 }
 0xb53   :  { %v1878_v45 = vunpack.c.l.bf16 %v1876_v42 }
 0xb55   :  { %v1882_v49 = vadd.f32 %v1880_v44, %v1878_v45 }
 0xb57   :  { %v1883_v46 = vpack.c.bf16 %v1882_v49, %v1881_v24 }
 0xb59   :  { %2305 = vmatmul.msk.bf16.vlgmr.msrb.gmra.mxu0 %vm1332_vm2, %v1883_v46 }
 0xbd6   :  { %v1916_v54 = vpop.f32.mrf.mxu0 }
 0xbd7   :  { %v1917_v48 = vadd.f32 %v2396_v47, %v1916_v54 }
 0xbd9   :  { %1921 = vst [vmem:[%s2965_s23] sm:$0xff] %v1917_v48 }
 0xbde   :  { %v1918_v50 = vpop.f32.mrf.mxu0 }
 0xbdf   :  { %v1919_v41 = vadd.f32 %v2396_v47, %v1918_v50 }
 0xbe1   :  { %1922 = vst [vmem:[%s2965_s23 + $0x8] sm:$0xff] %v1919_v41 }
 0xbe2   :  { %1927 = vsyncpa [#allocation3], 1 }

</bundles_post_ra>
